<compile_context>
chip_gen: v7x
topology: tpu7x:2x2x1
jax: 0.10.0
libtpu: 0.0.40
codegen_flags: <defaults>
</compile_context>

<pallas_src>
import jax
import jax.numpy as jnp
from jax import lax
from jax.experimental import pallas as pl
from jax.experimental.pallas import tpu as pltpu


# ------------------------------ static sizes -------------------------------
K1 = 5                      # conv kernel size (both convs)
C1_OUT = 16                 # conv1 output channels
C2_OUT = 32                 # conv2 output channels
H_IN = 28                   # input spatial size
H1 = H_IN - K1 + 1          # 24  conv1 output spatial
P1 = H1 // 2                # 12  pool1 output spatial
H2 = P1 - K1 + 1            # 8   conv2 output spatial
P2 = H2 // 2                # 4   pool2 output spatial
FC1, FC2, N_CLS = 120, 84, 10


# ------------------------------ fused kernel -------------------------------
def _lenet5_kernel(x_ref, m1_ref, b1t_ref, ph1_ref, pw1_ref,
                   m2_ref, b2t_ref, ph2_ref, pw2_ref,
                   fc1w_ref, fc1b_ref, fc2w_ref, fc2b_ref, fc3w_ref, fc3b_ref,
                   o_ref):
    f32 = jnp.float32

    # Image hoisted into a value once; everything below is static slices of it.
    x = x_ref[0]                                             # (28, 28)

    # ---- conv1: 5 banded matmuls contracting (kw, c_in) on the MXU ----------
    # y1[oh, ow*16 + c] = sum_kh sum_kw x[oh+kh, ow+kw] * W1[c, kh, kw]
    y1 = jnp.dot(x[0:H1, :], m1_ref[0], preferred_element_type=f32)
    for kh in range(1, K1):
        y1 += jnp.dot(x[kh:kh + H1, :], m1_ref[kh],
                      preferred_element_type=f32)            # (24, 384)
    a1 = jnp.tanh(y1 + b1t_ref[...])                         # lane-dense tanh

    # ---- pool1 (2x2 avg, 0.25 folded into pw1): two matmuls -----------------
    p1 = jnp.dot(jnp.dot(ph1_ref[...], a1, preferred_element_type=f32),
                 pw1_ref[...], preferred_element_type=f32)   # (12, 192)

    # ---- conv2: 5 banded matmuls contracting (kw, c_in) on the MXU ----------
    y2 = jnp.dot(p1[0:H2, :], m2_ref[0], preferred_element_type=f32)
    for kh in range(1, K1):
        y2 += jnp.dot(p1[kh:kh + H2, :], m2_ref[kh],
                      preferred_element_type=f32)            # (8, 256)
    a2 = jnp.tanh(y2 + b2t_ref[...])

    # ---- pool2 (2x2 avg) as two matmuls -> (4, 128) [ph2, pw2*32 + c2] ------
    p2 = jnp.dot(jnp.dot(ph2_ref[...], a2, preferred_element_type=f32),
                 pw2_ref[...], preferred_element_type=f32)   # (4, 128)

    # ---- fc1 (flatten folded into per-row weight blocks) -> fc2 -> fc3 ------
    h = fc1b_ref[...]                                        # (1, 120)
    for r in range(P2):
        h = h + jnp.dot(p2[r:r + 1, :], fc1w_ref[r],
                        preferred_element_type=f32)
    h = jnp.tanh(h)
    h = jnp.tanh(jnp.dot(h, fc2w_ref[...], preferred_element_type=f32)
                 + fc2b_ref[...])
    out = jnp.dot(h, fc3w_ref[...], preferred_element_type=f32) + fc3b_ref[...]
    o_ref[0] = out.astype(o_ref.dtype)                       # (1, 10)


# --------------------------- wrapper / param prep --------------------------
def prepare_params(p):
    """One-time repack of PyTorch-layout parameters into kernel layouts."""
    f32 = jnp.float32
    w1 = p["conv1_w"].astype(f32)[:, 0]                      # (16, 5, 5) c,kh,kw
    w2 = p["conv2_w"].astype(f32)                            # (32, 16, 5, 5)

    # conv1 banded matrices: m1[kh, w, ow*16 + c] = w1[c, kh, w - ow] (valid kw)
    ow = jnp.arange(H1)
    w_in = jnp.arange(H_IN)
    kwi = w_in[None, :] - ow[:, None]                        # (24, 28)
    valid = ((kwi >= 0) & (kwi < K1)).astype(f32)
    kwc = jnp.clip(kwi, 0, K1 - 1)
    v1 = w1[:, :, kwc] * valid[None, None]                   # (16, 5, 24, 28)
    m1 = v1.transpose(1, 3, 2, 0).reshape(K1, H_IN, H1 * C1_OUT)   # (5, 28, 384)

    # conv2 banded matrices: m2[kh, pw*16+c1, ow2*32+c2] = w2[c2,c1,kh,pw-ow2]
    ow2 = jnp.arange(H2)
    pw = jnp.arange(P1)
    kwi2 = pw[:, None] - ow2[None, :]                        # (12, 8)
    valid2 = ((kwi2 >= 0) & (kwi2 < K1)).astype(f32)
    kwc2 = jnp.clip(kwi2, 0, K1 - 1)
    v2 = w2[:, :, :, kwc2] * valid2[None, None, None]        # (32, 16, 5, 12, 8)
    m2 = v2.transpose(2, 3, 1, 4, 0).reshape(K1, P1 * C1_OUT, H2 * C2_OUT)

    # biases tiled to the lane-dense conv output layouts
    b1t = jnp.tile(p["conv1_b"].astype(f32)[None, :], (1, H1))      # (1, 384)
    b2t = jnp.tile(p["conv2_b"].astype(f32)[None, :], (1, H2))      # (1, 256)

    # 2x2 avg-pool matrices (0.25 folded into the width halves)
    ph1 = (jnp.arange(H1)[None, :] // 2 == jnp.arange(P1)[:, None]).astype(f32)
    pw1 = 0.25 * jnp.kron(
        (jnp.arange(H1)[:, None] // 2 == jnp.arange(P1)[None, :]).astype(f32),
        jnp.eye(C1_OUT, dtype=f32))                                  # (384, 192)
    ph2 = (jnp.arange(H2)[None, :] // 2 == jnp.arange(P2)[:, None]).astype(f32)
    pw2 = 0.25 * jnp.kron(
        (jnp.arange(H2)[:, None] // 2 == jnp.arange(P2)[None, :]).astype(f32),
        jnp.eye(C2_OUT, dtype=f32))                                  # (256, 128)

    # fc1 weights split per pooled row r=ph2, columns ordered (pw2, c2)
    fc1w = (p["fc1_w"].astype(f32).reshape(FC1, C2_OUT, P2, P2)
            .transpose(2, 3, 1, 0).reshape(P2, P2 * C2_OUT, FC1))    # (4,128,120)
    fc1b = p["fc1_b"].reshape(1, -1).astype(f32)
    fc2w = p["fc2_w"].T.astype(f32)
    fc2b = p["fc2_b"].reshape(1, -1).astype(f32)
    fc3w = p["fc3_w"].T.astype(f32)
    fc3b = p["fc3_b"].reshape(1, -1).astype(f32)
    return dict(m1=m1, b1t=b1t, ph1=ph1, pw1=pw1, m2=m2, b2t=b2t,
                ph2=ph2, pw2=pw2, fc1w=fc1w, fc1b=fc1b,
                fc2w=fc2w, fc2b=fc2b, fc3w=fc3w, fc3b=fc3b)


@jax.jit
def lenet5_forward(x_nchw, q):
    n = x_nchw.shape[0]
    x3 = x_nchw[:, 0, :, :].astype(jnp.float32)              # (n, 28, 28)

    args = (x3, q["m1"], q["b1t"], q["ph1"], q["pw1"], q["m2"], q["b2t"],
            q["ph2"], q["pw2"], q["fc1w"], q["fc1b"], q["fc2w"], q["fc2b"],
            q["fc3w"], q["fc3b"])

    def resident(a):                       # full-array block, stays in VMEM
        nd = a.ndim
        return pl.BlockSpec(a.shape, lambda i, _nd=nd: (0,) * _nd)

    in_specs = [pl.BlockSpec((1, H_IN, H_IN), lambda i: (i, 0, 0))]
    in_specs += [resident(a) for a in args[1:]]

    out = pl.pallas_call(
        _lenet5_kernel,
        out_shape=jax.ShapeDtypeStruct((n, 1, N_CLS), jnp.float32),
        grid=(n,),
        in_specs=in_specs,
        out_specs=pl.BlockSpec((1, 1, N_CLS), lambda i: (i, 0, 0)),
        compiler_params=pltpu.CompilerParams(
            dimension_semantics=("parallel",)),
    )(*args)
    return out.reshape(n, N_CLS)


# ------------------------------- reference ---------------------------------
def lenet5_reference(x_nchw, p):
    x = x_nchw.astype(jnp.float32)
    dn = ("NCHW", "OIHW", "NCHW")
    y = lax.conv_general_dilated(x, p["conv1_w"], (1, 1), "VALID",
                                 dimension_numbers=dn)
    y = jnp.tanh(y + p["conv1_b"][None, :, None, None])
    n, c, h, w = y.shape
    y = y.reshape(n, c, h // 2, 2, w // 2, 2).mean(axis=(3, 5))
    y = lax.conv_general_dilated(y, p["conv2_w"], (1, 1), "VALID",
                                 dimension_numbers=dn)
    y = jnp.tanh(y + p["conv2_b"][None, :, None, None])
    n, c, h, w = y.shape
    y = y.reshape(n, c, h // 2, 2, w // 2, 2).mean(axis=(3, 5))
    f = y.reshape(n, -1)                       # NCHW .view order
    hh = jnp.tanh(f @ p["fc1_w"].T + p["fc1_b"])
    hh = jnp.tanh(hh @ p["fc2_w"].T + p["fc2_b"])
    return hh @ p["fc3_w"].T + p["fc3_b"]


def init_params(key):
    ks = jax.random.split(key, 10)

    def uni(k, shape, fan_in):
        bound = 1.0 / (fan_in ** 0.5)
        return jax.random.uniform(k, shape, jnp.float32, -bound, bound)

    return {
        "conv1_w": uni(ks[0], (16, 1, 5, 5), 1 * 5 * 5),
        "conv1_b": uni(ks[1], (16,), 1 * 5 * 5),
        "conv2_w": uni(ks[2], (32, 16, 5, 5), 16 * 5 * 5),
        "conv2_b": uni(ks[3], (32,), 16 * 5 * 5),
        "fc1_w": uni(ks[4], (120, 512), 512),
        "fc1_b": uni(ks[5], (120,), 512),
        "fc2_w": uni(ks[6], (84, 120), 120),
        "fc2_b": uni(ks[7], (84,), 120),
        "fc3_w": uni(ks[8], (10, 84), 84),
        "fc3_b": uni(ks[9], (10,), 84),
    }


if __name__ == "__main__":
    key = jax.random.PRNGKey(0)
    pkey, xkey = jax.random.split(key)
    params = init_params(pkey)
    # LeNet5's fc1 (32*4*4 inputs) implies 28x28 single-channel input (MNIST).
    x = jax.random.normal(xkey, (2, 1, 28, 28), jnp.float32)   # NCHW like torch

    q = prepare_params(params)          # one-time weight repack (outside jit)
    logits = lenet5_forward(x, q)
    logits = jax.block_until_ready(logits)

    assert logits.shape == (2, 10)
    assert bool(jnp.all(jnp.isfinite(logits)))
    ref = lenet5_reference(x, params)
    err = float(jnp.max(jnp.abs(logits - ref)))
    assert err < 5e-2, err
    print("KERNEL_OK")
</pallas_src>

<mosaic_0001>
module attributes {stable_mosaic.version = 11 : i64} {
  func.func @_lenet5_kernel(%arg0: i32, %arg1: memref<1x28x28xf32, #tpu.memory_space<vmem>>, %arg2: memref<5x28x384xf32, #tpu.memory_space<vmem>>, %arg3: memref<1x384xf32, #tpu.memory_space<vmem>>, %arg4: memref<12x24xf32, #tpu.memory_space<vmem>>, %arg5: memref<384x192xf32, #tpu.memory_space<vmem>>, %arg6: memref<5x192x256xf32, #tpu.memory_space<vmem>>, %arg7: memref<1x256xf32, #tpu.memory_space<vmem>>, %arg8: memref<4x8xf32, #tpu.memory_space<vmem>>, %arg9: memref<256x128xf32, #tpu.memory_space<vmem>>, %arg10: memref<4x128x120xf32, #tpu.memory_space<vmem>>, %arg11: memref<1x120xf32, #tpu.memory_space<vmem>>, %arg12: memref<120x84xf32, #tpu.memory_space<vmem>>, %arg13: memref<1x84xf32, #tpu.memory_space<vmem>>, %arg14: memref<84x10xf32, #tpu.memory_space<vmem>>, %arg15: memref<1x10xf32, #tpu.memory_space<vmem>>, %arg16: memref<1x1x10xf32, #tpu.memory_space<vmem>>) attributes {dimension_semantics = [#tpu.dimension_semantics<parallel>], iteration_bounds = array<i64: 2>, scalar_prefetch = 0 : i64, scratch_operands = 0 : i64, tpu.core_type = #tpu.core_type<tc>, window_params = [{transform_indices = @transform_0, window_bounds = array<i64: 1, 28, 28>}, {pipeline_mode = #tpu.pipeline_mode<synchronous>, transform_indices = @transform_1, window_bounds = array<i64: 5, 28, 384>}, {pipeline_mode = #tpu.pipeline_mode<synchronous>, transform_indices = @transform_2, window_bounds = array<i64: 1, 384>}, {pipeline_mode = #tpu.pipeline_mode<synchronous>, transform_indices = @transform_3, window_bounds = array<i64: 12, 24>}, {pipeline_mode = #tpu.pipeline_mode<synchronous>, transform_indices = @transform_4, window_bounds = array<i64: 384, 192>}, {pipeline_mode = #tpu.pipeline_mode<synchronous>, transform_indices = @transform_5, window_bounds = array<i64: 5, 192, 256>}, {pipeline_mode = #tpu.pipeline_mode<synchronous>, transform_indices = @transform_6, window_bounds = array<i64: 1, 256>}, {pipeline_mode = #tpu.pipeline_mode<synchronous>, transform_indices = @transform_7, window_bounds = array<i64: 4, 8>}, {pipeline_mode = #tpu.pipeline_mode<synchronous>, transform_indices = @transform_8, window_bounds = array<i64: 256, 128>}, {pipeline_mode = #tpu.pipeline_mode<synchronous>, transform_indices = @transform_9, window_bounds = array<i64: 4, 128, 120>}, {pipeline_mode = #tpu.pipeline_mode<synchronous>, transform_indices = @transform_10, window_bounds = array<i64: 1, 120>}, {pipeline_mode = #tpu.pipeline_mode<synchronous>, transform_indices = @transform_11, window_bounds = array<i64: 120, 84>}, {pipeline_mode = #tpu.pipeline_mode<synchronous>, transform_indices = @transform_12, window_bounds = array<i64: 1, 84>}, {pipeline_mode = #tpu.pipeline_mode<synchronous>, transform_indices = @transform_13, window_bounds = array<i64: 84, 10>}, {pipeline_mode = #tpu.pipeline_mode<synchronous>, transform_indices = @transform_14, window_bounds = array<i64: 1, 10>}, {transform_indices = @transform_15, window_bounds = array<i64: 1, 1, 10>}]} {
    %c0 = arith.constant 0 : index
    %c0_0 = arith.constant 0 : index
    %c0_1 = arith.constant 0 : index
    %0 = vector.load %arg1[%c0, %c0_0, %c0_1] : memref<1x28x28xf32, #tpu.memory_space<vmem>>, vector<1x28x28xf32>
    %1 = vector.shape_cast %0 : vector<1x28x28xf32> to vector<28x28xf32>
    %2 = vector.extract_strided_slice %1 {offsets = [0, 0], sizes = [24, 28], strides = [1, 1]} : vector<28x28xf32> to vector<24x28xf32>
    %c0_2 = arith.constant 0 : index
    %c0_3 = arith.constant 0 : index
    %c0_4 = arith.constant 0 : index
    %3 = vector.load %arg2[%c0_2, %c0_3, %c0_4] : memref<5x28x384xf32, #tpu.memory_space<vmem>>, vector<1x28x384xf32>
    %4 = vector.shape_cast %3 : vector<1x28x384xf32> to vector<28x384xf32>
    %cst = arith.constant dense<0.000000e+00> : vector<24x384xf32>
    %5 = tpu.matmul %2, %4, %cst {dimension_numbers = #tpu.dot_dimension_numbers<[1], [0], [0], [1], [0, 0, 1, 1], [], []>} : vector<24x28xf32>, vector<28x384xf32>, vector<24x384xf32> -> vector<24x384xf32>
    %6 = vector.extract_strided_slice %1 {offsets = [1, 0], sizes = [24, 28], strides = [1, 1]} : vector<28x28xf32> to vector<24x28xf32>
    %c1 = arith.constant 1 : index
    %c0_5 = arith.constant 0 : index
    %c0_6 = arith.constant 0 : index
    %7 = vector.load %arg2[%c1, %c0_5, %c0_6] : memref<5x28x384xf32, #tpu.memory_space<vmem>>, vector<1x28x384xf32>
    %8 = vector.shape_cast %7 : vector<1x28x384xf32> to vector<28x384xf32>
    %cst_7 = arith.constant dense<0.000000e+00> : vector<24x384xf32>
    %9 = tpu.matmul %6, %8, %cst_7 {dimension_numbers = #tpu.dot_dimension_numbers<[1], [0], [0], [1], [0, 0, 1, 1], [], []>} : vector<24x28xf32>, vector<28x384xf32>, vector<24x384xf32> -> vector<24x384xf32>
    %10 = arith.addf %5, %9 : vector<24x384xf32>
    %11 = vector.extract_strided_slice %1 {offsets = [2, 0], sizes = [24, 28], strides = [1, 1]} : vector<28x28xf32> to vector<24x28xf32>
    %c2 = arith.constant 2 : index
    %c0_8 = arith.constant 0 : index
    %c0_9 = arith.constant 0 : index
    %12 = vector.load %arg2[%c2, %c0_8, %c0_9] : memref<5x28x384xf32, #tpu.memory_space<vmem>>, vector<1x28x384xf32>
    %13 = vector.shape_cast %12 : vector<1x28x384xf32> to vector<28x384xf32>
    %cst_10 = arith.constant dense<0.000000e+00> : vector<24x384xf32>
    %14 = tpu.matmul %11, %13, %cst_10 {dimension_numbers = #tpu.dot_dimension_numbers<[1], [0], [0], [1], [0, 0, 1, 1], [], []>} : vector<24x28xf32>, vector<28x384xf32>, vector<24x384xf32> -> vector<24x384xf32>
    %15 = arith.addf %10, %14 : vector<24x384xf32>
    %16 = vector.extract_strided_slice %1 {offsets = [3, 0], sizes = [24, 28], strides = [1, 1]} : vector<28x28xf32> to vector<24x28xf32>
    %c3 = arith.constant 3 : index
    %c0_11 = arith.constant 0 : index
    %c0_12 = arith.constant 0 : index
    %17 = vector.load %arg2[%c3, %c0_11, %c0_12] : memref<5x28x384xf32, #tpu.memory_space<vmem>>, vector<1x28x384xf32>
    %18 = vector.shape_cast %17 : vector<1x28x384xf32> to vector<28x384xf32>
    %cst_13 = arith.constant dense<0.000000e+00> : vector<24x384xf32>
    %19 = tpu.matmul %16, %18, %cst_13 {dimension_numbers = #tpu.dot_dimension_numbers<[1], [0], [0], [1], [0, 0, 1, 1], [], []>} : vector<24x28xf32>, vector<28x384xf32>, vector<24x384xf32> -> vector<24x384xf32>
    %20 = arith.addf %15, %19 : vector<24x384xf32>
    %21 = vector.extract_strided_slice %1 {offsets = [4, 0], sizes = [24, 28], strides = [1, 1]} : vector<28x28xf32> to vector<24x28xf32>
    %c4 = arith.constant 4 : index
    %c0_14 = arith.constant 0 : index
    %c0_15 = arith.constant 0 : index
    %22 = vector.load %arg2[%c4, %c0_14, %c0_15] : memref<5x28x384xf32, #tpu.memory_space<vmem>>, vector<1x28x384xf32>
    %23 = vector.shape_cast %22 : vector<1x28x384xf32> to vector<28x384xf32>
    %cst_16 = arith.constant dense<0.000000e+00> : vector<24x384xf32>
    %24 = tpu.matmul %21, %23, %cst_16 {dimension_numbers = #tpu.dot_dimension_numbers<[1], [0], [0], [1], [0, 0, 1, 1], [], []>} : vector<24x28xf32>, vector<28x384xf32>, vector<24x384xf32> -> vector<24x384xf32>
    %25 = arith.addf %20, %24 : vector<24x384xf32>
    %c0_17 = arith.constant 0 : index
    %c0_18 = arith.constant 0 : index
    %26 = vector.load %arg3[%c0_17, %c0_18] : memref<1x384xf32, #tpu.memory_space<vmem>>, vector<1x384xf32>
    %27 = vector.broadcast %26 : vector<1x384xf32> to vector<24x384xf32>
    %28 = arith.addf %25, %27 : vector<24x384xf32>
    %29 = math.tanh %28 : vector<24x384xf32>
    %c0_19 = arith.constant 0 : index
    %c0_20 = arith.constant 0 : index
    %30 = vector.load %arg4[%c0_19, %c0_20] : memref<12x24xf32, #tpu.memory_space<vmem>>, vector<12x24xf32>
    %cst_21 = arith.constant dense<0.000000e+00> : vector<12x384xf32>
    %31 = tpu.matmul %30, %29, %cst_21 {dimension_numbers = #tpu.dot_dimension_numbers<[1], [0], [0], [1], [0, 0, 1, 1], [], []>} : vector<12x24xf32>, vector<24x384xf32>, vector<12x384xf32> -> vector<12x384xf32>
    %c0_22 = arith.constant 0 : index
    %c0_23 = arith.constant 0 : index
    %32 = vector.load %arg5[%c0_22, %c0_23] : memref<384x192xf32, #tpu.memory_space<vmem>>, vector<384x192xf32>
    %cst_24 = arith.constant dense<0.000000e+00> : vector<12x192xf32>
    %33 = tpu.matmul %31, %32, %cst_24 {dimension_numbers = #tpu.dot_dimension_numbers<[1], [0], [0], [1], [0, 0, 1, 1], [], []>} : vector<12x384xf32>, vector<384x192xf32>, vector<12x192xf32> -> vector<12x192xf32>
    %34 = vector.extract_strided_slice %33 {offsets = [0, 0], sizes = [8, 192], strides = [1, 1]} : vector<12x192xf32> to vector<8x192xf32>
    %c0_25 = arith.constant 0 : index
    %c0_26 = arith.constant 0 : index
    %c0_27 = arith.constant 0 : index
    %35 = vector.load %arg6[%c0_25, %c0_26, %c0_27] : memref<5x192x256xf32, #tpu.memory_space<vmem>>, vector<1x192x256xf32>
    %36 = vector.shape_cast %35 : vector<1x192x256xf32> to vector<192x256xf32>
    %cst_28 = arith.constant dense<0.000000e+00> : vector<8x256xf32>
    %37 = tpu.matmul %34, %36, %cst_28 {dimension_numbers = #tpu.dot_dimension_numbers<[1], [0], [0], [1], [0, 0, 1, 1], [], []>} : vector<8x192xf32>, vector<192x256xf32>, vector<8x256xf32> -> vector<8x256xf32>
    %38 = vector.extract_strided_slice %33 {offsets = [1, 0], sizes = [8, 192], strides = [1, 1]} : vector<12x192xf32> to vector<8x192xf32>
    %c1_29 = arith.constant 1 : index
    %c0_30 = arith.constant 0 : index
    %c0_31 = arith.constant 0 : index
    %39 = vector.load %arg6[%c1_29, %c0_30, %c0_31] : memref<5x192x256xf32, #tpu.memory_space<vmem>>, vector<1x192x256xf32>
    %40 = vector.shape_cast %39 : vector<1x192x256xf32> to vector<192x256xf32>
    %cst_32 = arith.constant dense<0.000000e+00> : vector<8x256xf32>
    %41 = tpu.matmul %38, %40, %cst_32 {dimension_numbers = #tpu.dot_dimension_numbers<[1], [0], [0], [1], [0, 0, 1, 1], [], []>} : vector<8x192xf32>, vector<192x256xf32>, vector<8x256xf32> -> vector<8x256xf32>
    %42 = arith.addf %37, %41 : vector<8x256xf32>
    %43 = vector.extract_strided_slice %33 {offsets = [2, 0], sizes = [8, 192], strides = [1, 1]} : vector<12x192xf32> to vector<8x192xf32>
    %c2_33 = arith.constant 2 : index
    %c0_34 = arith.constant 0 : index
    %c0_35 = arith.constant 0 : index
    %44 = vector.load %arg6[%c2_33, %c0_34, %c0_35] : memref<5x192x256xf32, #tpu.memory_space<vmem>>, vector<1x192x256xf32>
    %45 = vector.shape_cast %44 : vector<1x192x256xf32> to vector<192x256xf32>
    %cst_36 = arith.constant dense<0.000000e+00> : vector<8x256xf32>
    %46 = tpu.matmul %43, %45, %cst_36 {dimension_numbers = #tpu.dot_dimension_numbers<[1], [0], [0], [1], [0, 0, 1, 1], [], []>} : vector<8x192xf32>, vector<192x256xf32>, vector<8x256xf32> -> vector<8x256xf32>
    %47 = arith.addf %42, %46 : vector<8x256xf32>
    %48 = vector.extract_strided_slice %33 {offsets = [3, 0], sizes = [8, 192], strides = [1, 1]} : vector<12x192xf32> to vector<8x192xf32>
    %c3_37 = arith.constant 3 : index
    %c0_38 = arith.constant 0 : index
    %c0_39 = arith.constant 0 : index
    %49 = vector.load %arg6[%c3_37, %c0_38, %c0_39] : memref<5x192x256xf32, #tpu.memory_space<vmem>>, vector<1x192x256xf32>
    %50 = vector.shape_cast %49 : vector<1x192x256xf32> to vector<192x256xf32>
    %cst_40 = arith.constant dense<0.000000e+00> : vector<8x256xf32>
    %51 = tpu.matmul %48, %50, %cst_40 {dimension_numbers = #tpu.dot_dimension_numbers<[1], [0], [0], [1], [0, 0, 1, 1], [], []>} : vector<8x192xf32>, vector<192x256xf32>, vector<8x256xf32> -> vector<8x256xf32>
    %52 = arith.addf %47, %51 : vector<8x256xf32>
    %53 = vector.extract_strided_slice %33 {offsets = [4, 0], sizes = [8, 192], strides = [1, 1]} : vector<12x192xf32> to vector<8x192xf32>
    %c4_41 = arith.constant 4 : index
    %c0_42 = arith.constant 0 : index
    %c0_43 = arith.constant 0 : index
    %54 = vector.load %arg6[%c4_41, %c0_42, %c0_43] : memref<5x192x256xf32, #tpu.memory_space<vmem>>, vector<1x192x256xf32>
    %55 = vector.shape_cast %54 : vector<1x192x256xf32> to vector<192x256xf32>
    %cst_44 = arith.constant dense<0.000000e+00> : vector<8x256xf32>
    %56 = tpu.matmul %53, %55, %cst_44 {dimension_numbers = #tpu.dot_dimension_numbers<[1], [0], [0], [1], [0, 0, 1, 1], [], []>} : vector<8x192xf32>, vector<192x256xf32>, vector<8x256xf32> -> vector<8x256xf32>
    %57 = arith.addf %52, %56 : vector<8x256xf32>
    %c0_45 = arith.constant 0 : index
    %c0_46 = arith.constant 0 : index
    %58 = vector.load %arg7[%c0_45, %c0_46] : memref<1x256xf32, #tpu.memory_space<vmem>>, vector<1x256xf32>
    %59 = vector.broadcast %58 : vector<1x256xf32> to vector<8x256xf32>
    %60 = arith.addf %57, %59 : vector<8x256xf32>
    %61 = math.tanh %60 : vector<8x256xf32>
    %c0_47 = arith.constant 0 : index
    %c0_48 = arith.constant 0 : index
    %62 = vector.load %arg8[%c0_47, %c0_48] : memref<4x8xf32, #tpu.memory_space<vmem>>, vector<4x8xf32>
    %cst_49 = arith.constant dense<0.000000e+00> : vector<4x256xf32>
    %63 = tpu.matmul %62, %61, %cst_49 {dimension_numbers = #tpu.dot_dimension_numbers<[1], [0], [0], [1], [0, 0, 1, 1], [], []>} : vector<4x8xf32>, vector<8x256xf32>, vector<4x256xf32> -> vector<4x256xf32>
    %c0_50 = arith.constant 0 : index
    %c0_51 = arith.constant 0 : index
    %64 = vector.load %arg9[%c0_50, %c0_51] : memref<256x128xf32, #tpu.memory_space<vmem>>, vector<256x128xf32>
    %cst_52 = arith.constant dense<0.000000e+00> : vector<4x128xf32>
    %65 = tpu.matmul %63, %64, %cst_52 {dimension_numbers = #tpu.dot_dimension_numbers<[1], [0], [0], [1], [0, 0, 1, 1], [], []>} : vector<4x256xf32>, vector<256x128xf32>, vector<4x128xf32> -> vector<4x128xf32>
    %c0_53 = arith.constant 0 : index
    %c0_54 = arith.constant 0 : index
    %66 = vector.load %arg11[%c0_53, %c0_54] : memref<1x120xf32, #tpu.memory_space<vmem>>, vector<1x120xf32>
    %67 = vector.extract_strided_slice %65 {offsets = [0, 0], sizes = [1, 128], strides = [1, 1]} : vector<4x128xf32> to vector<1x128xf32>
    %c0_55 = arith.constant 0 : index
    %c0_56 = arith.constant 0 : index
    %c0_57 = arith.constant 0 : index
    %68 = vector.load %arg10[%c0_55, %c0_56, %c0_57] : memref<4x128x120xf32, #tpu.memory_space<vmem>>, vector<1x128x120xf32>
    %69 = vector.shape_cast %68 : vector<1x128x120xf32> to vector<128x120xf32>
    %cst_58 = arith.constant dense<0.000000e+00> : vector<1x120xf32>
    %70 = tpu.matmul %67, %69, %cst_58 {dimension_numbers = #tpu.dot_dimension_numbers<[1], [0], [0], [1], [0, 0, 1, 1], [], []>} : vector<1x128xf32>, vector<128x120xf32>, vector<1x120xf32> -> vector<1x120xf32>
    %71 = arith.addf %66, %70 : vector<1x120xf32>
    %72 = vector.extract_strided_slice %65 {offsets = [1, 0], sizes = [1, 128], strides = [1, 1]} : vector<4x128xf32> to vector<1x128xf32>
    %c1_59 = arith.constant 1 : index
    %c0_60 = arith.constant 0 : index
    %c0_61 = arith.constant 0 : index
    %73 = vector.load %arg10[%c1_59, %c0_60, %c0_61] : memref<4x128x120xf32, #tpu.memory_space<vmem>>, vector<1x128x120xf32>
    %74 = vector.shape_cast %73 : vector<1x128x120xf32> to vector<128x120xf32>
    %cst_62 = arith.constant dense<0.000000e+00> : vector<1x120xf32>
    %75 = tpu.matmul %72, %74, %cst_62 {dimension_numbers = #tpu.dot_dimension_numbers<[1], [0], [0], [1], [0, 0, 1, 1], [], []>} : vector<1x128xf32>, vector<128x120xf32>, vector<1x120xf32> -> vector<1x120xf32>
    %76 = arith.addf %71, %75 : vector<1x120xf32>
    %77 = vector.extract_strided_slice %65 {offsets = [2, 0], sizes = [1, 128], strides = [1, 1]} : vector<4x128xf32> to vector<1x128xf32>
    %c2_63 = arith.constant 2 : index
    %c0_64 = arith.constant 0 : index
    %c0_65 = arith.constant 0 : index
    %78 = vector.load %arg10[%c2_63, %c0_64, %c0_65] : memref<4x128x120xf32, #tpu.memory_space<vmem>>, vector<1x128x120xf32>
    %79 = vector.shape_cast %78 : vector<1x128x120xf32> to vector<128x120xf32>
    %cst_66 = arith.constant dense<0.000000e+00> : vector<1x120xf32>
    %80 = tpu.matmul %77, %79, %cst_66 {dimension_numbers = #tpu.dot_dimension_numbers<[1], [0], [0], [1], [0, 0, 1, 1], [], []>} : vector<1x128xf32>, vector<128x120xf32>, vector<1x120xf32> -> vector<1x120xf32>
    %81 = arith.addf %76, %80 : vector<1x120xf32>
    %82 = vector.extract_strided_slice %65 {offsets = [3, 0], sizes = [1, 128], strides = [1, 1]} : vector<4x128xf32> to vector<1x128xf32>
    %c3_67 = arith.constant 3 : index
    %c0_68 = arith.constant 0 : index
    %c0_69 = arith.constant 0 : index
    %83 = vector.load %arg10[%c3_67, %c0_68, %c0_69] : memref<4x128x120xf32, #tpu.memory_space<vmem>>, vector<1x128x120xf32>
    %84 = vector.shape_cast %83 : vector<1x128x120xf32> to vector<128x120xf32>
    %cst_70 = arith.constant dense<0.000000e+00> : vector<1x120xf32>
    %85 = tpu.matmul %82, %84, %cst_70 {dimension_numbers = #tpu.dot_dimension_numbers<[1], [0], [0], [1], [0, 0, 1, 1], [], []>} : vector<1x128xf32>, vector<128x120xf32>, vector<1x120xf32> -> vector<1x120xf32>
    %86 = arith.addf %81, %85 : vector<1x120xf32>
    %87 = math.tanh %86 : vector<1x120xf32>
    %c0_71 = arith.constant 0 : index
    %c0_72 = arith.constant 0 : index
    %88 = vector.load %arg12[%c0_71, %c0_72] : memref<120x84xf32, #tpu.memory_space<vmem>>, vector<120x84xf32>
    %cst_73 = arith.constant dense<0.000000e+00> : vector<1x84xf32>
    %89 = tpu.matmul %87, %88, %cst_73 {dimension_numbers = #tpu.dot_dimension_numbers<[1], [0], [0], [1], [0, 0, 1, 1], [], []>} : vector<1x120xf32>, vector<120x84xf32>, vector<1x84xf32> -> vector<1x84xf32>
    %c0_74 = arith.constant 0 : index
    %c0_75 = arith.constant 0 : index
    %90 = vector.load %arg13[%c0_74, %c0_75] : memref<1x84xf32, #tpu.memory_space<vmem>>, vector<1x84xf32>
    %91 = arith.addf %89, %90 : vector<1x84xf32>
    %92 = math.tanh %91 : vector<1x84xf32>
    %c0_76 = arith.constant 0 : index
    %c0_77 = arith.constant 0 : index
    %93 = vector.load %arg14[%c0_76, %c0_77] : memref<84x10xf32, #tpu.memory_space<vmem>>, vector<84x10xf32>
    %cst_78 = arith.constant dense<0.000000e+00> : vector<1x10xf32>
    %94 = tpu.matmul %92, %93, %cst_78 {dimension_numbers = #tpu.dot_dimension_numbers<[1], [0], [0], [1], [0, 0, 1, 1], [], []>} : vector<1x84xf32>, vector<84x10xf32>, vector<1x10xf32> -> vector<1x10xf32>
    %c0_79 = arith.constant 0 : index
    %c0_80 = arith.constant 0 : index
    %95 = vector.load %arg15[%c0_79, %c0_80] : memref<1x10xf32, #tpu.memory_space<vmem>>, vector<1x10xf32>
    %96 = arith.addf %94, %95 : vector<1x10xf32>
    %c0_81 = arith.constant 0 : index
    %c0_82 = arith.constant 0 : index
    %c0_83 = arith.constant 0 : index
    %97 = vector.load %arg16[%c0_81, %c0_82, %c0_83] : memref<1x1x10xf32, #tpu.memory_space<vmem>>, vector<1x1x10xf32>
    %98 = vector.shape_cast %97 : vector<1x1x10xf32> to vector<1x10xf32>
    %99 = vector.shape_cast %96 : vector<1x10xf32> to vector<1x1x10xf32>
    tpu.vector_store %arg16[%c0_81, %c0_82, %c0_83], %99 {strides = array<i32>} : memref<1x1x10xf32, #tpu.memory_space<vmem>>, vector<1x1x10xf32>,
    return
  }
  func.func @transform_0(%arg0: i32) -> (i32, i32, i32) {
    %c0_i32 = arith.constant 0 : i32
    %c0_i32_0 = arith.constant 0 : i32
    %c0_i32_1 = arith.constant 0 : i32
    return %arg0, %c0_i32, %c0_i32_0 : i32, i32, i32
  }
  func.func @transform_1(%arg0: i32) -> (i32, i32, i32) {
    %c0_i32 = arith.constant 0 : i32
    %c0_i32_0 = arith.constant 0 : i32
    %c0_i32_1 = arith.constant 0 : i32
    %c0_i32_2 = arith.constant 0 : i32
    return %c0_i32, %c0_i32_0, %c0_i32_1 : i32, i32, i32
  }
  func.func @transform_2(%arg0: i32) -> (i32, i32) {
    %c0_i32 = arith.constant 0 : i32
    %c0_i32_0 = arith.constant 0 : i32
    %c0_i32_1 = arith.constant 0 : i32
    return %c0_i32, %c0_i32_0 : i32, i32
  }
  func.func @transform_3(%arg0: i32) -> (i32, i32) {
    %c0_i32 = arith.constant 0 : i32
    %c0_i32_0 = arith.constant 0 : i32
    %c0_i32_1 = arith.constant 0 : i32
    return %c0_i32, %c0_i32_0 : i32, i32
  }
  func.func @transform_4(%arg0: i32) -> (i32, i32) {
    %c0_i32 = arith.constant 0 : i32
    %c0_i32_0 = arith.constant 0 : i32
    %c0_i32_1 = arith.constant 0 : i32
    return %c0_i32, %c0_i32_0 : i32, i32
  }
  func.func @transform_5(%arg0: i32) -> (i32, i32, i32) {
    %c0_i32 = arith.constant 0 : i32
    %c0_i32_0 = arith.constant 0 : i32
    %c0_i32_1 = arith.constant 0 : i32
    %c0_i32_2 = arith.constant 0 : i32
    return %c0_i32, %c0_i32_0, %c0_i32_1 : i32, i32, i32
  }
  func.func @transform_6(%arg0: i32) -> (i32, i32) {
    %c0_i32 = arith.constant 0 : i32
    %c0_i32_0 = arith.constant 0 : i32
    %c0_i32_1 = arith.constant 0 : i32
    return %c0_i32, %c0_i32_0 : i32, i32
  }
  func.func @transform_7(%arg0: i32) -> (i32, i32) {
    %c0_i32 = arith.constant 0 : i32
    %c0_i32_0 = arith.constant 0 : i32
    %c0_i32_1 = arith.constant 0 : i32
    return %c0_i32, %c0_i32_0 : i32, i32
  }
  func.func @transform_8(%arg0: i32) -> (i32, i32) {
    %c0_i32 = arith.constant 0 : i32
    %c0_i32_0 = arith.constant 0 : i32
    %c0_i32_1 = arith.constant 0 : i32
    return %c0_i32, %c0_i32_0 : i32, i32
  }
  func.func @transform_9(%arg0: i32) -> (i32, i32, i32) {
    %c0_i32 = arith.constant 0 : i32
    %c0_i32_0 = arith.constant 0 : i32
    %c0_i32_1 = arith.constant 0 : i32
    %c0_i32_2 = arith.constant 0 : i32
    return %c0_i32, %c0_i32_0, %c0_i32_1 : i32, i32, i32
  }
  func.func @transform_10(%arg0: i32) -> (i32, i32) {
    %c0_i32 = arith.constant 0 : i32
    %c0_i32_0 = arith.constant 0 : i32
    %c0_i32_1 = arith.constant 0 : i32
    return %c0_i32, %c0_i32_0 : i32, i32
  }
  func.func @transform_11(%arg0: i32) -> (i32, i32) {
    %c0_i32 = arith.constant 0 : i32
    %c0_i32_0 = arith.constant 0 : i32
    %c0_i32_1 = arith.constant 0 : i32
    return %c0_i32, %c0_i32_0 : i32, i32
  }
  func.func @transform_12(%arg0: i32) -> (i32, i32) {
    %c0_i32 = arith.constant 0 : i32
    %c0_i32_0 = arith.constant 0 : i32
    %c0_i32_1 = arith.constant 0 : i32
    return %c0_i32, %c0_i32_0 : i32, i32
  }
  func.func @transform_13(%arg0: i32) -> (i32, i32) {
    %c0_i32 = arith.constant 0 : i32
    %c0_i32_0 = arith.constant 0 : i32
    %c0_i32_1 = arith.constant 0 : i32
    return %c0_i32, %c0_i32_0 : i32, i32
  }
  func.func @transform_14(%arg0: i32) -> (i32, i32) {
    %c0_i32 = arith.constant 0 : i32
    %c0_i32_0 = arith.constant 0 : i32
    %c0_i32_1 = arith.constant 0 : i32
    return %c0_i32, %c0_i32_0 : i32, i32
  }
  func.func @transform_15(%arg0: i32) -> (i32, i32, i32) {
    %c0_i32 = arith.constant 0 : i32
    %c0_i32_0 = arith.constant 0 : i32
    %c0_i32_1 = arith.constant 0 : i32
    return %arg0, %c0_i32, %c0_i32_0 : i32, i32, i32
  }
}

</mosaic_0001>

<bundles_post_ra>
// kernel: lenet5_forward.1
= control target key start
LH: loop header
LB: loop body
LE: loop exit
PB: predicated region body
PF: predicated region fallthrough
CT: control target
= control target key end

     0   :  { %s7048_s0 = inlined_call_operand.vmem [shape: f32[2,28,28], index: 0, kind: input, shape index: {}]   ;;  %s7049_s1 = inlined_call_operand.vmem [shape: f32[5,28,384], index: 1, kind: input, shape index: {}]   ;;  %s7050_s2 = inlined_call_operand.vmem [shape: f32[1,384], index: 2, kind: input, shape index: {}]   ;;  %s7051_s3 = inlined_call_operand.vmem [shape: f32[12,24], index: 3, kind: input, shape index: {}]   ;;  %s7052_s4 = inlined_call_operand.vmem [shape: f32[384,192], index: 4, kind: input, shape index: {}]   ;;  %s7053_s5 = inlined_call_operand.vmem [shape: f32[5,192,256], index: 5, kind: input, shape index: {}]   ;;  %s7054_s6 = inlined_call_operand.vmem [shape: f32[1,256], index: 6, kind: input, shape index: {}]   ;;  %s7055_s7 = inlined_call_operand.vmem [shape: f32[4,8], index: 7, kind: input, shape index: {}]   ;;  %s7056_s8 = inlined_call_operand.vmem [shape: f32[256,128], index: 8, kind: input, shape index: {}]   ;;  %s7057_s9 = inlined_call_operand.vmem [shape: f32[4,128,120], index: 9, kind: input, shape index: {}]   ;;  %s7058_s10 = inlined_call_operand.vmem [shape: f32[1,120], index: 10, kind: input, shape index: {}]   ;;  %s7059_s11 = inlined_call_operand.vmem [shape: f32[120,84], index: 11, kind: input, shape index: {}]   ;;  %s7060_s12 = inlined_call_operand.vmem [shape: f32[1,84], index: 12, kind: input, shape index: {}]   ;;  %s7061_s13 = inlined_call_operand.vmem [shape: f32[84,10], index: 13, kind: input, shape index: {}]   ;;  %s7062_s14 = inlined_call_operand.vmem [shape: f32[1,10], index: 14, kind: input, shape index: {}]   ;;  %s7063_s15 = inlined_call_operand.hbm [shape: f32[2,1,10], index: 15, kind: output, shape index: {}]  }
   0x1   :  { %7071 = sst [smem:[#allocation11_spill]] %s7062_s14 }
   0x2   :  { %7072 = sst [smem:[#allocation12_spill]] %s7063_s15 }
   0x3   :  { %20 = vsyncpa [#allocation3], 0 }
   0x4   :  { %22 = vsyncpa [#allocation3 + $0x1], 0  ;;  %s5085_s18 = smov 0   ;;  %s5087_s19 = smov 0  }
   0x5   :  { %s5089_s20 = smov 0   ;;  %s5091_s21 = smov 0  }
   0x6 LB: > { %7073 = sst [smem:[#allocation5_spill]] %s4986_s18  ;;  %s5106_s22 = sadd.s32 4294967295, %s4998_s21   ;;  %s4998_s21 = sphi %s5091_s21, %s7088_s21   ;;  %s4994_s20 = sphi %s5089_s20, %s7090_s20   ;;  %s4990_s19 = sphi %s5087_s19, %s7092_s19   ;;  %s4986_s18 = sphi %s5085_s18, %s7091_s18  }
   0x7   : > { %7074 = sst [smem:[#allocation6_spill]] %s4994_s20  ;;  %s3412_s23 = sadd.s32 4294967294, %s4998_s21  }
   0x8   : > { %7075 = sst [smem:[#allocation7_spill]] %s4998_s21  ;;  %s5110_s24 = sadd.s32 1, %s4998_s21  }
   0x9   : > { %7076 = sst [smem:[#allocation8_spill]] %s5110_s24  ;;  %s355_s25 = sadd.s32 1, %s4994_s20 }
   0xa   : > { %s352_s26 = ssub.s32 %s4998_s21, %s5110_s24  ;;  %p365_p0 = scmp.ne.s32.totalorder %s4994_s20, %s4990_s19 }
   0xb   : > { %p353_p1 = scmp.eq.s32.totalorder %s352_s26, 0  ;;  %p366_p2 = scmp.eq.s32.totalorder %s5106_s22, 1 }
   0xc   : > { %p371_p3 = scmp.ne.s32.totalorder %s4990_s19, %s4986_s18  ;;  %p372_p4 = scmp.eq.s32.totalorder %s3412_s23, 1 }
   0xd   : > { %s5121_s27 = scalar_select %p353_p1, %s4994_s20, %s355_s25  }
   0xe   : > { %p5123_p5 = por %p366_p2, %p365_p0  ;;  %p5127_p6 = por %p372_p4, %p371_p3 }
   0xf   : > { %7077 = sst [smem:[#allocation9_spill]] %s5121_s27  ;;  %p3415_p7 = scmp.ge.s32.totalorder %s4998_s21, 1 }
  0x10   : > { %s7079_s29 = scalar_select %p5127_p6, 1, 0 }
  0x11   : > { %p440_p8 = scmp.lt.s32.totalorder %s4998_s21, 3 }
  0x12   : > { %7080 = sst [smem:[#allocation10_spill]] %s7079_s29 }
  0x13   : > { %p441_p9 = pnand %p3415_p7, %p440_p8 }
  0x14   : > { %v3419_v0 = vld [vmem:[%s7049_s1 + $0x68] sm:$0xff] (!%p441_p9)  ;;  %v3422_v1 = vld [vmem:[%s7049_s1 + $0x80] sm:$0xff] (!%p441_p9)  ;;  %v3420_v2 = vld [vmem:[%s7049_s1 + $0x70] sm:$0xff] (!%p441_p9)  ;;  %vm540_vm0 = vcmask (!%p441_p9), 1043456   ;;  %v5000_v3 = vmov (!%p441_p9), 0.0|0.0   ;;  %p487_p10 = scmp.lt.s32.totalorder (!%p441_p9), %s5106_s22, 1 }
  0x15   : > { %444 = sbr.rel (%p441_p9) target bundleno = 2412 (0x96c), region = 80  ;;  %4241 = vmatprep.subr.bf16.mxu1 (!%p441_p9), %v5000_v3  ;;  %v4231_v4 = vpack.c.bf16 (!%p441_p9), %v3422_v1, %v3419_v0  ;;  %v3423_v5 = vld [vmem:[%s7049_s1 + $0x88] sm:$0xff] (!%p441_p9)  ;;  %v3418_v6 = vld [vmem:[%s7049_s1 + $0x60] sm:$0xff] (!%p441_p9)  ;;  %v3421_v7 = vld [vmem:[%s7049_s1 + $0x78] sm:$0xff] (!%p441_p9)  ;;  %vm5001_vm1 = vmmov (!%p441_p9), 1   ;;  %vm5002_vm3 = vmmov (!%p441_p9), 0  }
  0x16   : > { %v4242_v8 = vpack.c.bf16 (!%p441_p9), %v3423_v5, %v3420_v2  ;;  %v4233_v9 = vpack.c.bf16 (!%p441_p9), %v3421_v7, %v3418_v6  ;;  %v3425_v10 = vld [vmem:[%s7049_s1 + $0x98] sm:$0xff] (!%p441_p9)  ;;  %v3428_v11 = vld [vmem:[%s7049_s1 + $0xb0] sm:$0xf] (!%p441_p9)  ;;  %vm5160_vm2 = vmpackc.low (!%p441_p9), %vm540_vm0, %vm5001_vm1  ;;  %v5003_v13 = vmov (!%p441_p9), 0.0   ;;  %vm525_vm4 = vcmask (!%p441_p9), 1046528   ;;  %s485_s21 = sand.u32 (!%p441_p9), 1, %s4990_s19  }
  0x17   : > { %3947 = vmatprep.mubr.msk.f32.mxu1 (!%p441_p9), %vm5002_vm3, %v5003_v13  ;;  %614 = vmatprep.mubr.f32.mxu0 (!%p441_p9), %v5003_v13  ;;  %v4235_v14 = vpack.c.bf16 (!%p441_p9), %v3428_v11, %v3425_v10  ;;  %v3426_v15 = vld [vmem:[%s7049_s1 + $0xa0] sm:$0xff] (!%p441_p9)  ;;  %v3429_v16 = vld [vmem:[%s7049_s1 + $0xb8] sm:$0xf] (!%p441_p9)  ;;  %v3424_v17 = vld [vmem:[%s7049_s1 + $0x90] sm:$0xff] (!%p441_p9)  ;;  %vm533_vm5 = vcmask (!%p441_p9), 228352   ;;  %vm904_vm6 = vcmask (!%p441_p9), 1045504  }
  0x18   : > { %4232 = vmatprep.subr.bf16.mxu0 (!%p441_p9), %v4231_v4  ;;  %4243 = vmatpush3.bf16.msra.mxu1 (!%p441_p9), %v4242_v8  ;;  %v4245_v18 = vpack.c.bf16 (!%p441_p9), %v3429_v16, %v3426_v15  ;;  %v3427_v19 = vld [vmem:[%s7049_s1 + $0xa8] sm:$0xf] (!%p441_p9)  ;;  %v500_v21 = vld [vmem:[%s7049_s1 + $0x20] sm:$0xff] (!%p441_p9)  ;;  %v498_v24 = vld [vmem:[%s7049_s1 + $0x10] sm:$0xff] (!%p441_p9)  ;;  %vm1112_vm7 = vcmask (!%p441_p9), 1044480   ;;  %vm1551_vm8 = vcmask (!%p441_p9), 195584  }
  0x19   : > { %4234 = vmatpush1.bf16.msra.mxu0 (!%p441_p9), %v4233_v9  ;;  %v497_v20 = vld [vmem:[%s7049_s1 + $0x8] sm:$0xff] (!%p441_p9)  ;;  %4244 = vmatprep.subr.bf16.mxu1 (!%p441_p9), %v5000_v3  ;;  %v4238_v22 = vpack.c.bf16 (!%p441_p9), %v3427_v19, %v3424_v17  ;;  %v496_v26 = vld [vmem:[%s7049_s1] sm:$0xff] (!%p441_p9)  ;;  %v499_v27 = vld [vmem:[%s7049_s1 + $0x18] sm:$0xff] (!%p441_p9)  ;;  %vm2068_vm9 = vcmask (!%p441_p9), 523264   ;;  %vm2625_vm10 = vcmask (!%p441_p9), 64512   ;;  %vm3178_vm11 = vcmask (!%p441_p9), 982016  }
  0x1a   : > { %4237 = vmatprep.subr.msk.bf16.mxu0 (!%p441_p9), %vm5160_vm2, %v4235_v14  ;;  %v4248_v23 = vpack.c.bf16 (!%p441_p9), %v500_v21, %v497_v20  ;;  %v501_v25 = vld [vmem:[%s7049_s1 + $0x28] sm:$0xff] (!%p441_p9)  ;;  %v503_v28 = vld [vmem:[%s7049_s1 + $0x38] sm:$0xff] (!%p441_p9)  ;;  %v506_v29 = vld [vmem:[%s7049_s1 + $0x50] sm:$0xf] (!%p441_p9)  ;;  %v4250_v37 = vpack.c.bf16 (!%p441_p9), %v499_v27, %v496_v26  ;;  %vm3265_vm12 = vcmask (!%p441_p9), 687104   ;;  %s7083_s20 = sld [smem:[#allocation11_spill]] (!%p441_p9) }
  0x1b   : > { %v4259_v36 = vpack.c.bf16 (!%p441_p9), %v501_v25, %v498_v24  ;;  %v504_v39 = vld [vmem:[%s7049_s1 + $0x40] sm:$0xff] (!%p441_p9)  ;;  %v4252_v41 = vpack.c.bf16 (!%p441_p9), %v506_v29, %v503_v28  ;;  %v507_v42 = vld [vmem:[%s7049_s1 + $0x58] sm:$0xf] (!%p441_p9)  ;;  %v502_v43 = vld [vmem:[%s7049_s1 + $0x30] sm:$0xff] (!%p441_p9)  ;;  %s3764_s29 = sshll.u32 (!%p441_p9), %s5106_s22, 4  ;;  %s486_s24 = scalar_lea.vmem (!%p441_p9), [#allocation2], %s485_s21 }
  0x1c   : > { %s488_s25 = scalar_select %p487_p10, %s5106_s22, 1  ;;  %4247 = vmatpush3.bf16.msk.msra.mxu1 %vm5160_vm2, %v4245_v18  ;;  %v505_v44 = vld [vmem:[%s7049_s1 + $0x48] sm:$0xf]  ;;  %v3452_v46 = vld [vmem:[%s7049_s1 + $0xe0] sm:$0xff]  ;;  %v4262_v49 = vpack.c.bf16 %v507_v42, %v504_v39  ;;  %v3450_v53 = vld [vmem:[%s7049_s1 + $0xd0] sm:$0xff]  ;;  %vm3342_vm13 = vcmask 73728  }
  0x1d   : > { %4240 = vmatpush1.bf16.msk.msra.mxu0 %vm5160_vm2, %v4238_v22  ;;  %4258 = vmatprep.subr.bf16.mxu1 %v5000_v3  ;;  %v3449_v45 = vld [vmem:[%s7049_s1 + $0xc8] sm:$0xff]  ;;  %v4255_v50 = vpack.c.bf16 %v505_v44, %v502_v43  ;;  %v3448_v55 = vld [vmem:[%s7049_s1 + $0xc0] sm:$0xff]  ;;  %v3451_v56 = vld [vmem:[%s7049_s1 + $0xd8] sm:$0xff]  ;;  %s3345_s23 = scalar_lea.sflag [#allocation3], %s485_s21  ;;  %s5004_s22 = smov [#allocation2]  }
  0x1e   : > { %s3767_s16 = sshll.u32 %s488_s25, 5  ;;  %4249 = vmatprep.subr.bf16.mxu0 %v4248_v23  ;;  %v4265_v51 = vpack.c.bf16 %v3452_v46, %v3449_v45  ;;  %v3453_v54 = vld [vmem:[%s7049_s1 + $0xe8] sm:$0xff]  ;;  %v3455_v57 = vld [vmem:[%s7049_s1 + $0xf8] sm:$0xff]  ;;  %v3458_v58 = vld [vmem:[%s7049_s1 + $0x110] sm:$0xf]  ;;  %v4267_v60 = vpack.c.bf16 %v3451_v56, %v3448_v55  ;;  %s7084_s25 = sld [smem:[#allocation12_spill]] }
  0x1f   : > { %s491_s18 = scalar_lea.vmem %s7048_s0, %s3767_s16  ;;  %v4276_v59 = vpack.c.bf16 %v3453_v54, %v3450_v53  ;;  %v3456_v61 = vld [vmem:[%s7049_s1 + $0x100] sm:$0xff]  ;;  %v4269_v62 = vpack.c.bf16 %v3458_v58, %v3455_v57  ;;  %v3459_v63 = vld [vmem:[%s7049_s1 + $0x118] sm:$0xf]  ;;  %v3454_v0 = vld [vmem:[%s7049_s1 + $0xf0] sm:$0xff]  ;;  %s4940_s15 = sshll.u32 %s5004_s22, 4  ;;  %s4941_s15 = int_to_ptr.vmem [resolvable:$false] %s4940_s15 }
  0x20   : > { %v5212_v30 = vld [vmem:[%s491_s18] sm:$0xff]  ;;  %v5214_v31 = vld [vmem:[%s491_s18 + $0x8] sm:$0xff]  ;;  %v5216_v32 = vld [vmem:[%s491_s18 + $0x10] sm:$0xff]  ;;  %v4279_v5 = vpack.c.bf16 %v3459_v63, %v3456_v61  ;;  %s4942_s16 = scalar_lea.vmem %s4941_s15, 32 }
  0x21   : > { %v526_v33 = vrot.slane %v5212_v30, 1  ;;  %v527_v34 = vrot.slane %v5214_v31, 1  ;;  %v529_v35 = vrot.slane %v5216_v32, 1  ;;  %v5226_v38 = vld [vmem:[%s491_s18 + $0x18] sm:$0xf]  ;;  %v3470_v2 = vld [vmem:[%s7049_s1 + $0x128] sm:$0xff] }
  0x22   : > { %v531_v48 = vrot.slane %v5226_v38, 1  ;;  %v3457_v1 = vld [vmem:[%s7049_s1 + $0x108] sm:$0xf]  ;;  %v3473_v4 = vld [vmem:[%s7049_s1 + $0x140] sm:$0xff]  ;;  %v905_v8 = vrot.slane %v5212_v30, 2  ;;  %v906_v9 = vrot.slane %v5214_v31, 2 }
  0x23   : > { %v528_v40 = vsel %vm525_vm4, %v526_v33, %v527_v34  ;;  %v530_v47 = vsel %vm525_vm4, %v527_v34, %v529_v35  ;;  %v4272_v6 = vpack.c.bf16 %v3457_v1, %v3454_v0  ;;  %v4282_v7 = vpack.c.bf16 %v3473_v4, %v3470_v2  ;;  %v3471_v10 = vld [vmem:[%s7049_s1 + $0x130] sm:$0xff]  ;;  %v3474_v11 = vld [vmem:[%s7049_s1 + $0x148] sm:$0xff]  ;;  %v3469_v14 = vld [vmem:[%s7049_s1 + $0x120] sm:$0xff]  ;;  %s3357_s18 = sshll.u32 %s486_s24, 4  ;;  %s7008_s18 = int_to_ptr.vmem [resolvable:$true] %s3357_s18 }
  0x24   : > { %3948 = vmatmul.mubr.msk.f32.vlgmr.msra.gmra.mrb[0].mxu1 %vm533_vm5, %v528_v40  ;;  %3432 = vmatmul.mubr.msk.f32.vlgmr.msra.gmra.mrb[0].mxu0 %vm533_vm5, %v528_v40  ;;  %v532_v52 = vsel %vm525_vm4, %v529_v35, %v531_v48  ;;  %v3472_v15 = vld [vmem:[%s7049_s1 + $0x138] sm:$0xff]  ;;  %v3479_v17 = vld [vmem:[%s7049_s1 + $0x170] sm:$0xf]  ;;  %v907_v18 = vsel %vm904_vm6, %v905_v8, %v906_v9  ;;  %v908_v19 = vrot.slane %v5216_v32, 2  ;;  %v4293_v20 = vpack.c.bf16 %v3474_v11, %v3471_v10  ;;  %v3477_v22 = vld [vmem:[%s7049_s1 + $0x160] sm:$0xff]  ;;  %s7006_s17 = scalar_lea.hbm %s7084_s25, %s3764_s29  ;;  %s4936_s14 = scalar_lea.vmem %s7008_s18, 16 }
  0x25   : > { %3950 = vmatprep.mubr.msk.f32.mxu1 %vm5002_vm3, %v5003_v13  ;;  %620 = vmatprep.mubr.f32.mxu0 %v5003_v13  ;;  %v3476_v16 = vld [vmem:[%s7049_s1 + $0x158] sm:$0xff]  ;;  %v4284_v21 = vpack.c.bf16 %v3472_v15, %v3469_v14  ;;  %v3475_v25 = vld [vmem:[%s7049_s1 + $0x150] sm:$0xff]  ;;  %v3478_v26 = vld [vmem:[%s7049_s1 + $0x168] sm:$0xf]  ;;  %v910_v33 = vrot.slane %v5226_v38, 2  ;;  %v1113_v39 = vrot.slane %v5212_v30, 3  ;;  %p4937_p11 = scmp.ne.s32.totalorder %s7008_s18, %s4936_s14  ;;  %p4943_p0 = scmp.lt.s32.totalorder %s7008_s18, %s4941_s15 }
  0x26   : > { %4260 = vmatpush3.bf16.msra.mxu1 %v4259_v36  ;;  %4251 = vmatpush1.bf16.msra.mxu0 %v4250_v37  ;;  %v4286_v23 = vpack.c.bf16 %v3479_v17, %v3476_v16  ;;  %v3480_v24 = vld [vmem:[%s7049_s1 + $0x178] sm:$0xf]  ;;  %v3491_v27 = vld [vmem:[%s7049_s1 + $0x188] sm:$0xff]  ;;  %v3494_v28 = vld [vmem:[%s7049_s1 + $0x1a0] sm:$0xff]  ;;  %v909_v29 = vsel %vm904_vm6, %v906_v9, %v908_v19  ;;  %v4289_v35 = vpack.c.bf16 %v3478_v26, %v3475_v25  ;;  %v1114_v40 = vrot.slane %v5214_v31, 3  ;;  %p4944_p1 = scmp.lt.s32.totalorder %s4942_s16, %s4936_s14 }
  0x27   : > { %4261 = vmatprep.subr.bf16.mxu1 %v5000_v3  ;;  %4254 = vmatprep.subr.msk.bf16.mxu0 %vm5160_vm2, %v4252_v41  ;;  %v4296_v34 = vpack.c.bf16 %v3480_v24, %v3477_v22  ;;  %v4299_v36 = vpack.c.bf16 %v3494_v28, %v3491_v27  ;;  %v911_v37 = vsel %vm904_vm6, %v908_v19, %v910_v33  ;;  %v3492_v41 = vld [vmem:[%s7049_s1 + $0x190] sm:$0xff]  ;;  %v3495_v42 = vld [vmem:[%s7049_s1 + $0x1a8] sm:$0xff]  ;;  %v3490_v43 = vld [vmem:[%s7049_s1 + $0x180] sm:$0xff]  ;;  %v1116_v48 = vrot.slane %v5216_v32, 3  ;;  %p4938_p12 = pnand %p4937_p11, %p5123_p5 }
  0x28   : > { %3951 = vmatmul.mubr.msk.f32.gmra.mrb[2].mxu1 %vm533_vm5, %v530_v47  ;;  %3433 = vmatmul.mubr.msk.f32.gmra.mrb[2].mxu0 %vm533_vm5, %v530_v47  ;;  %v3493_v44 = vld [vmem:[%s7049_s1 + $0x198] sm:$0xff]  ;;  %v3500_v46 = vld [vmem:[%s7049_s1 + $0x1d0] sm:$0xf]  ;;  %v1115_v47 = vsel %vm1112_vm7, %v1113_v39, %v1114_v40  ;;  %v3499_v55 = vld [vmem:[%s7049_s1 + $0x1c8] sm:$0xf]  ;;  %v1118_v57 = vrot.slane %v5226_v38, 3  ;;  %p4945_p2 = por %p4944_p1, %p4943_p0 }
  0x29   : > { %3953 = vmatprep.mubr.msk.f32.mxu1 %vm5002_vm3, %v5003_v13  ;;  %626 = vmatprep.mubr.f32.mxu0 %v5003_v13  ;;  %v3497_v45 = vld [vmem:[%s7049_s1 + $0x1b8] sm:$0xff]  ;;  %v3496_v54 = vld [vmem:[%s7049_s1 + $0x1b0] sm:$0xff]  ;;  %v1117_v56 = vsel %vm1112_vm7, %v1114_v40, %v1116_v48  ;;  %v1320_v61 = vrot.slane %v5212_v30, 4  ;;  %v1710_v1 = vld [vmem:[%s7052_s4] sm:$0xff]  ;;  %p4939_p13 = pneg %p4938_p12 }
  0x2a   : > { %4264 = vmatpush3.bf16.msk.msra.mxu1 %vm5160_vm2, %v4262_v49  ;;  %4257 = vmatpush1.bf16.msk.msra.mxu0 %vm5160_vm2, %v4255_v50  ;;  %v4310_v49 = vpack.c.bf16 %v3495_v42, %v3492_v41  ;;  %v4301_v50 = vpack.c.bf16 %v3493_v44, %v3490_v43  ;;  %v3501_v53 = vld [vmem:[%s7049_s1 + $0x1d8] sm:$0xf]  ;;  %v1712_v4 = vld [vmem:[%s7052_s4 + $0x10] sm:$0xff]  ;;  %v1714_v9 = vld [vmem:[%s7052_s4 + $0x20] sm:$0xff] }
  0x2b   : > { %4275 = vmatprep.subr.bf16.mxu1 %v5000_v3  ;;  %4266 = vmatprep.subr.bf16.mxu0 %v4265_v51  ;;  %v3498_v51 = vld [vmem:[%s7049_s1 + $0x1c0] sm:$0xff]  ;;  %v1713_v0 = vld [vmem:[%s7052_s4 + $0x18] sm:$0xff]  ;;  %v1716_v10 = vld [vmem:[%s7052_s4 + $0x30] sm:$0xff]  ;;  %p4946_p3 = pnand %p4945_p2, %p4939_p13 }
  0x2c   : > { %3954 = vmatmul.mubr.msk.f32.gmra.mrb[4].mxu1 %vm533_vm5, %v532_v52  ;;  %3434 = vmatmul.mubr.msk.f32.gmra.mrb[4].mxu0 %vm533_vm5, %v532_v52  ;;  %v4303_v52 = vpack.c.bf16 %v3500_v46, %v3497_v45  ;;  %v4313_v58 = vpack.c.bf16 %v3501_v53, %v3498_v51  ;;  %v1719_v11 = vld [vmem:[%s7052_s4 + $0x48] sm:$0xff]  ;;  %v1721_v14 = vld [vmem:[%s7052_s4 + $0x58] sm:$0xff]  ;;  %v4330_v15 = vpack.c.bf16 %v1716_v10, %v1714_v9  ;;  %v1718_v17 = vld [vmem:[%s7052_s4 + $0x40] sm:$0xff] }
  0x2d   : > { %3964 = vmatprep.mubr.msk.f32.mxu1 %vm5002_vm3, %v5003_v13  ;;  %792 = vmatprep.mubr.f32.mxu0 %v5003_v13  ;;  %v4332_v16 = vpack.c.bf16 %v1721_v14, %v1719_v11  ;;  %v1723_v19 = vld [vmem:[%s7052_s4 + $0x68] sm:$0xff]  ;;  %v1724_v24 = vld [vmem:[%s7052_s4 + $0x70] sm:$0xff]  ;;  %v1729_v26 = vld [vmem:[%s7052_s4 + $0x98] sm:$0xff] }
  0x2e   : > { %v1727_v25 = vld [vmem:[%s7052_s4 + $0x88] sm:$0xff]  ;;  %v1728_v33 = vld [vmem:[%s7052_s4 + $0x90] sm:$0xff]  ;;  %v1730_v39 = vld [vmem:[%s7052_s4 + $0xa0] sm:$0xff] }
  0x2f   : > { %v4340_v28 = vpack.c.bf16 %v1729_v26, %v1727_v25  ;;  %v1732_v40 = vld [vmem:[%s7052_s4 + $0xb0] sm:$0xff]  ;;  %v1735_v41 = vld [vmem:[%s7052_s4 + $0xc8] sm:$0xff]  ;;  %v1737_v42 = vld [vmem:[%s7052_s4 + $0xd8] sm:$0xff] }
  0x30   : > { %3965 = vmatmul.mubr.msk.f32.vlgmr.msra.gmra.mrb[6].mxu1 %vm533_vm5, %v5212_v30  ;;  %3441 = vmatmul.mubr.msk.f32.vlgmr.msra.gmra.mrb[0].mxu0 %vm533_vm5, %v5212_v30  ;;  %v1323_v30 = vrot.slane %v5216_v32, 4  ;;  %v4346_v43 = vpack.c.bf16 %v1732_v40, %v1730_v39  ;;  %v4348_v44 = vpack.c.bf16 %v1737_v42, %v1735_v41  ;;  %v1734_v45 = vld [vmem:[%s7052_s4 + $0xc0] sm:$0xff]  ;;  %v1736_v46 = vld [vmem:[%s7052_s4 + $0xd0] sm:$0xff]  ;;  %v1743_v53 = vld [vmem:[%s7052_s4 + $0x108] sm:$0xff] }
  0x31   : > { %3967 = vmatprep.mubr.msk.f32.mxu1 %vm5002_vm3, %v5003_v13  ;;  %798 = vmatprep.mubr.f32.mxu0 %v5003_v13  ;;  %v1738_v51 = vld [vmem:[%s7052_s4 + $0xe0] sm:$0xff]  ;;  %v1759_v9 = vld [vmem:[%s7052_s4 + $0x188] sm:$0xff]  ;;  %v1761_v10 = vld [vmem:[%s7052_s4 + $0x198] sm:$0xff] }
  0x32   : > { %4277 = vmatpush3.bf16.msra.mxu1 %v4276_v59  ;;  %4268 = vmatpush1.bf16.msra.mxu0 %v4267_v60  ;;  %v4306_v59 = vpack.c.bf16 %v3499_v55, %v3496_v54  ;;  %v1119_v60 = vsel %vm1112_vm7, %v1116_v48, %v1118_v57  ;;  %v1741_v48 = vld [vmem:[%s7052_s4 + $0xf8] sm:$0xff]  ;;  %v1742_v57 = vld [vmem:[%s7052_s4 + $0x100] sm:$0xff]  ;;  %v1764_v25 = vld [vmem:[%s7052_s4 + $0x1b0] sm:$0xff] }
  0x33   : > { %4278 = vmatprep.subr.bf16.mxu1 %v5000_v3  ;;  %4271 = vmatprep.subr.msk.bf16.mxu0 %vm5160_vm2, %v4269_v62  ;;  %v1321_v62 = vrot.slane %v5214_v31, 4  ;;  %v1745_v54 = vld [vmem:[%s7052_s4 + $0x118] sm:$0xff]  ;;  %v1771_v39 = vld [vmem:[%s7052_s4 + $0x1e8] sm:$0xff] }
  0x34   : > { %3968 = vmatmul.mubr.msk.f32.gmra.mrb[8].mxu1 %vm533_vm5, %v5214_v31  ;;  %3442 = vmatmul.mubr.msk.f32.gmra.mrb[2].mxu0 %vm533_vm5, %v5214_v31  ;;  %v1325_v31 = vrot.slane %v5226_v38, 4  ;;  %v1711_v38 = vld [vmem:[%s7052_s4 + $0x8] sm:$0xff]  ;;  %v1773_v40 = vld [vmem:[%s7052_s4 + $0x1f8] sm:$0xff] }
  0x35   : > { %3970 = vmatprep.mubr.msk.f32.mxu1 %vm5002_vm3, %v5003_v13  ;;  %804 = vmatprep.mubr.f32.mxu0 %v5003_v13  ;;  %v1322_v63 = vsel %vm540_vm0, %v1320_v61, %v1321_v62  ;;  %v1324_v12 = vsel %vm540_vm0, %v1321_v62, %v1323_v30  ;;  %v4324_v2 = vpack.c.bf16 %v1713_v0, %v1711_v38  ;;  %v1750_v0 = vld [vmem:[%s7052_s4 + $0x140] sm:$0xff] }
  0x36   : > { %4281 = vmatpush3.bf16.msk.msra.mxu1 %vm5160_vm2, %v4279_v5  ;;  %4274 = vmatpush1.bf16.msk.msra.mxu0 %vm5160_vm2, %v4272_v6  ;;  %v1715_v5 = vld [vmem:[%s7052_s4 + $0x28] sm:$0xff]  ;;  %v1717_v6 = vld [vmem:[%s7052_s4 + $0x38] sm:$0xff] }
  0x37   : > { %4292 = vmatprep.subr.bf16.mxu1 %v5000_v3  ;;  %4283 = vmatprep.subr.bf16.mxu0 %v4282_v7  ;;  %v4326_v7 = vpack.c.bf16 %v1712_v4, %v1710_v1  ;;  %v4328_v8 = vpack.c.bf16 %v1717_v6, %v1715_v5  ;;  %v1752_v1 = vld [vmem:[%s7052_s4 + $0x150] sm:$0xff]  ;;  %v1757_v4 = vld [vmem:[%s7052_s4 + $0x178] sm:$0xff] }
  0x38   : > { %3971 = vmatmul.mubr.msk.f32.gmra.mrb[10].mxu1 %vm533_vm5, %v5216_v32  ;;  %3443 = vmatmul.mubr.msk.f32.gmra.mrb[4].mxu0 %vm533_vm5, %v5216_v32  ;;  %v1326_v32 = vsel %vm540_vm0, %v1323_v30, %v1325_v31  ;;  %v1748_v30 = vld [vmem:[%s7052_s4 + $0x130] sm:$0xff]  ;;  %v1753_v31 = vld [vmem:[%s7052_s4 + $0x158] sm:$0xff]  ;;  %v4366_v5 = vpack.c.bf16 %v1752_v1, %v1750_v0 }
  0x39   : > { %3981 = vmatprep.mubr.msk.f32.mxu1 %vm5002_vm3, %v5003_v13  ;;  %991 = vmatprep.mubr.f32.mxu0 %v5003_v13 }
  0x3c   : > { %3982 = vmatmul.mubr.msk.f32.vlgmr.msra.gmra.mrb[12].mxu1 %vm533_vm5, %v907_v18  ;;  %3462 = vmatmul.mubr.msk.f32.vlgmr.msra.gmra.mrb[0].mxu0 %vm533_vm5, %v907_v18  ;;  %v1720_v18 = vld [vmem:[%s7052_s4 + $0x50] sm:$0xff] }
  0x3d   : > { %3984 = vmatprep.mubr.msk.f32.mxu1 %vm5002_vm3, %v5003_v13  ;;  %997 = vmatprep.mubr.f32.mxu0 %v5003_v13 }
  0x3e   : > { %4294 = vmatpush3.bf16.msra.mxu1 %v4293_v20  ;;  %4285 = vmatpush1.bf16.msra.mxu0 %v4284_v21  ;;  %v1725_v20 = vld [vmem:[%s7052_s4 + $0x78] sm:$0xff]  ;;  %v4334_v21 = vpack.c.bf16 %v1720_v18, %v1718_v17  ;;  %v1760_v17 = vld [vmem:[%s7052_s4 + $0x190] sm:$0xff] }
  0x3f   : > { %4295 = vmatprep.subr.bf16.mxu1 %v5000_v3  ;;  %4288 = vmatprep.subr.msk.bf16.mxu0 %vm5160_vm2, %v4286_v23  ;;  %v4336_v22 = vpack.c.bf16 %v1725_v20, %v1723_v19  ;;  %v1722_v23 = vld [vmem:[%s7052_s4 + $0x60] sm:$0xff]  ;;  %v1763_v19 = vld [vmem:[%s7052_s4 + $0x1a8] sm:$0xff]  ;;  %v1765_v20 = vld [vmem:[%s7052_s4 + $0x1b8] sm:$0xff] }
  0x40   : > { %3985 = vmatmul.mubr.msk.f32.gmra.mrb[14].mxu1 %vm533_vm5, %v909_v29  ;;  %3463 = vmatmul.mubr.msk.f32.gmra.mrb[2].mxu0 %vm533_vm5, %v909_v29  ;;  %v4338_v27 = vpack.c.bf16 %v1724_v24, %v1722_v23  ;;  %v1726_v29 = vld [vmem:[%s7052_s4 + $0x80] sm:$0xff]  ;;  %v4376_v23 = vpack.c.bf16 %v1765_v20, %v1763_v19 }
  0x41   : > { %3987 = vmatprep.mubr.msk.f32.mxu1 %vm5002_vm3, %v5003_v13  ;;  %1003 = vmatprep.mubr.f32.mxu0 %v5003_v13  ;;  %v1762_v24 = vld [vmem:[%s7052_s4 + $0x1a0] sm:$0xff] }
  0x42   : > { %4298 = vmatpush3.bf16.msk.msra.mxu1 %vm5160_vm2, %v4296_v34  ;;  %4291 = vmatpush1.bf16.msk.msra.mxu0 %vm5160_vm2, %v4289_v35  ;;  %v1731_v34 = vld [vmem:[%s7052_s4 + $0xa8] sm:$0xff]  ;;  %v1733_v35 = vld [vmem:[%s7052_s4 + $0xb8] sm:$0xff] }
  0x43   : > { %4309 = vmatprep.subr.bf16.mxu1 %v5000_v3  ;;  %4300 = vmatprep.subr.bf16.mxu0 %v4299_v36  ;;  %v4342_v36 = vpack.c.bf16 %v1728_v33, %v1726_v29  ;;  %v4378_v29 = vpack.c.bf16 %v1764_v25, %v1762_v24 }
  0x44   : > { %3988 = vmatmul.mubr.msk.f32.gmra.mrb[16].mxu1 %vm533_vm5, %v911_v37  ;;  %3464 = vmatmul.mubr.msk.f32.gmra.mrb[4].mxu0 %vm533_vm5, %v911_v37  ;;  %v4344_v37 = vpack.c.bf16 %v1733_v35, %v1731_v34  ;;  %v1766_v35 = vld [vmem:[%s7052_s4 + $0x1c0] sm:$0xff] }
  0x45   : > { %3998 = vmatprep.mubr.msk.f32.mxu1 %vm5002_vm3, %v5003_v13  ;;  %1199 = vmatprep.mubr.f32.mxu0 %v5003_v13 }
  0x48   : > { %3999 = vmatmul.mubr.msk.f32.vlgmr.msra.gmra.mrb[18].mxu1 %vm533_vm5, %v1115_v47  ;;  %3483 = vmatmul.mubr.msk.f32.vlgmr.msra.gmra.mrb[0].mxu0 %vm533_vm5, %v1115_v47  ;;  %v1739_v47 = vld [vmem:[%s7052_s4 + $0xe8] sm:$0xff] }
  0x49   : > { %4001 = vmatprep.mubr.msk.f32.mxu1 %vm5002_vm3, %v5003_v13  ;;  %1205 = vmatprep.mubr.f32.mxu0 %v5003_v13 }
  0x4a   : > { %4311 = vmatpush3.bf16.msra.mxu1 %v4310_v49  ;;  %4302 = vmatpush1.bf16.msra.mxu0 %v4301_v50  ;;  %v4350_v49 = vpack.c.bf16 %v1736_v46, %v1734_v45  ;;  %v4352_v50 = vpack.c.bf16 %v1741_v48, %v1739_v47  ;;  %v1772_v45 = vld [vmem:[%s7052_s4 + $0x1f0] sm:$0xff] }
  0x4b   : > { %4312 = vmatprep.subr.bf16.mxu1 %v5000_v3  ;;  %4305 = vmatprep.subr.msk.bf16.mxu0 %vm5160_vm2, %v4303_v52  ;;  %v1740_v52 = vld [vmem:[%s7052_s4 + $0xf0] sm:$0xff] }
  0x4c   : > { %4002 = vmatmul.mubr.msk.f32.gmra.mrb[20].mxu1 %vm533_vm5, %v1117_v56  ;;  %3484 = vmatmul.mubr.msk.f32.gmra.mrb[2].mxu0 %vm533_vm5, %v1117_v56  ;;  %v4354_v55 = vpack.c.bf16 %v1740_v52, %v1738_v51  ;;  %v4356_v56 = vpack.c.bf16 %v1745_v54, %v1743_v53 }
  0x4d   : > { %4004 = vmatprep.mubr.msk.f32.mxu1 %vm5002_vm3, %v5003_v13  ;;  %1211 = vmatprep.mubr.f32.mxu0 %v5003_v13 }
  0x4e   : > { %4315 = vmatpush3.bf16.msk.msra.mxu1 %vm5160_vm2, %v4313_v58  ;;  %4308 = vmatpush1.bf16.msk.msra.mxu0 %vm5160_vm2, %v4306_v59  ;;  %v1744_v58 = vld [vmem:[%s7052_s4 + $0x110] sm:$0xff]  ;;  %v1747_v59 = vld [vmem:[%s7052_s4 + $0x128] sm:$0xff] }
  0x4f   : > { %4325 = vmatprep.subr.bf16.mxu0 %v4324_v2  ;;  %v4358_v61 = vpack.c.bf16 %v1744_v58, %v1742_v57  ;;  %v1755_v2 = vld [vmem:[%s7052_s4 + $0x168] sm:$0xff] }
  0x50   : > { %4005 = vmatmul.mubr.msk.f32.gmra.mrb[22].mxu1 %vm533_vm5, %v1119_v60  ;;  %3485 = vmatmul.mubr.msk.f32.gmra.mrb[4].mxu0 %vm533_vm5, %v1119_v60  ;;  %v1749_v60 = vld [vmem:[%s7052_s4 + $0x138] sm:$0xff]  ;;  %v4368_v6 = vpack.c.bf16 %v1757_v4, %v1755_v2 }
  0x51   : > { %4015 = vmatprep.mubr.msk.f32.mxu1 %vm5002_vm3, %v5003_v13  ;;  %1406 = vmatprep.mubr.f32.mxu0 %v5003_v13  ;;  %v4360_v62 = vpack.c.bf16 %v1749_v60, %v1747_v59 }
  0x54   : > { %4016 = vmatmul.mubr.msk.f32.vlgmr.msra.gmra.mrb[24].mxu1 %vm533_vm5, %v1322_v63  ;;  %3504 = vmatmul.mubr.msk.f32.vlgmr.msra.gmra.mrb[0].mxu0 %vm533_vm5, %v1322_v63  ;;  %v1746_v63 = vld [vmem:[%s7052_s4 + $0x120] sm:$0xff] }
  0x55   : > { %4018 = vmatprep.mubr.msk.f32.mxu1 %vm5002_vm3, %v5003_v13  ;;  %1412 = vmatprep.mubr.f32.mxu0 %v5003_v13 }
  0x56   : > { %4327 = vmatpush1.bf16.msra.mxu0 %v4326_v7  ;;  %v1754_v7 = vld [vmem:[%s7052_s4 + $0x160] sm:$0xff] }
  0x57   : > { %4329 = vmatprep.subr.bf16.mxu0 %v4328_v8  ;;  %v1756_v8 = vld [vmem:[%s7052_s4 + $0x170] sm:$0xff] }
  0x58   : > { %4019 = vmatmul.mubr.msk.f32.gmra.mrb[26].mxu1 %vm533_vm5, %v1324_v12  ;;  %3505 = vmatmul.mubr.msk.f32.gmra.mrb[2].mxu0 %vm533_vm5, %v1324_v12  ;;  %v1751_v12 = vld [vmem:[%s7052_s4 + $0x148] sm:$0xff]  ;;  %v4370_v11 = vpack.c.bf16 %v1756_v8, %v1754_v7 }
  0x59   : > { %4021 = vmatprep.mubr.msk.f32.mxu1 %vm5002_vm3, %v5003_v13  ;;  %1418 = vmatprep.mubr.f32.mxu0 %v5003_v13  ;;  %v4364_v38 = vpack.c.bf16 %v1753_v31, %v1751_v12 }
  0x5a   : > { %4331 = vmatpush1.bf16.msra.mxu0 %v4330_v15  ;;  %v4372_v15 = vpack.c.bf16 %v1761_v10, %v1759_v9 }
  0x5b   : > { %4333 = vmatprep.subr.bf16.mxu0 %v4332_v16  ;;  %v1758_v16 = vld [vmem:[%s7052_s4 + $0x180] sm:$0xff] }
  0x5c   : > { %4022 = vmatmul.mubr.msk.f32.gmra.mrb[28].mxu1 %vm533_vm5, %v1326_v32  ;;  %3506 = vmatmul.mubr.msk.f32.gmra.mrb[4].mxu0 %vm533_vm5, %v1326_v32  ;;  %v4362_v32 = vpack.c.bf16 %v1748_v30, %v1746_v63  ;;  %v1516_v30 = vlaneseq }
  0x5d   : > { %1622 = vmatprep.mubr.f32.mxu1 %v5003_v13 }
  0x5e   : > { %4335 = vmatpush1.bf16.msra.mxu0 %v4334_v21  ;;  %v4374_v21 = vpack.c.bf16 %v1760_v17, %v1758_v16 }
  0x5f   : > { %4337 = vmatprep.subr.bf16.mxu0 %v4336_v22 }
  0x62   : > { %4339 = vmatpush1.bf16.msra.mxu0 %v4338_v27  ;;  %v1767_v27 = vld [vmem:[%s7052_s4 + $0x1c8] sm:$0xff] }
  0x63   : > { %4341 = vmatprep.subr.bf16.mxu0 %v4340_v28  ;;  %v1769_v28 = vld [vmem:[%s7052_s4 + $0x1d8] sm:$0xff] }
  0x64   : > { %v4380_v34 = vpack.c.bf16 %v1769_v28, %v1767_v27 }
  0x66   : > { %4343 = vmatpush1.bf16.msra.mxu0 %v4342_v36  ;;  %v1768_v36 = vld [vmem:[%s7052_s4 + $0x1d0] sm:$0xff] }
  0x67   : > { %4345 = vmatprep.subr.bf16.mxu0 %v4344_v37  ;;  %v4382_v41 = vpack.c.bf16 %v1768_v36, %v1766_v35 }
  0x6a   : > { %4347 = vmatpush1.bf16.msra.mxu0 %v4346_v43  ;;  %v4384_v43 = vpack.c.bf16 %v1773_v40, %v1771_v39 }
  0x6b   : > { %4349 = vmatprep.subr.bf16.mxu0 %v4348_v44  ;;  %v1770_v44 = vld [vmem:[%s7052_s4 + $0x1e0] sm:$0xff] }
  0x6c   : > { %v4386_v48 = vpack.c.bf16 %v1772_v45, %v1770_v44 }
  0x6e   : > { %4351 = vmatpush1.bf16.msra.mxu0 %v4350_v49 }
  0x6f   : > { %4353 = vmatprep.subr.bf16.mxu0 %v4352_v50 }
  0x72   : > { %4355 = vmatpush1.bf16.msra.mxu0 %v4354_v55 }
  0x73   : > { %4357 = vmatprep.subr.bf16.mxu0 %v4356_v56 }
  0x76   : > { %4359 = vmatpush1.bf16.msra.mxu0 %v4358_v61 }
  0x77   : > { %4361 = vmatprep.subr.bf16.mxu0 %v4360_v62 }
  0x7a   : > { %4363 = vmatpush1.bf16.msra.mxu0 %v4362_v32 }
  0x7b   : > { %4365 = vmatprep.subr.bf16.mxu0 %v4364_v38  ;;  %v5675_v38 = vshrl.u32 %v1516_v30, 7 }
  0x7d   : > { %v1518_v4 = vsub.s32 0, %v5675_v38  ;;  %v1526_v7 = vsub.s32 2, %v5675_v38 }
  0x7e   : > { %4367 = vmatpush1.bf16.msra.mxu0 %v4366_v5  ;;  %v1514_v5 = vld [vmem:[%s7050_s2] sm:$0x7] }
  0x7f   : > { %4369 = vmatprep.subr.bf16.mxu0 %v4368_v6  ;;  %v1522_v6 = vsub.s32 1, %v5675_v38  ;;  %v2701_v38 = vld [vmem:[%s7056_s8 + $0x8] sm:$0xff] }
  0x82   : > { %4371 = vmatpush1.bf16.msra.mxu0 %v4370_v11  ;;  %v1519_v11 = vrot.slane %v1514_v5, %v1518_v4 }
  0x83   : > { %4373 = vmatprep.subr.bf16.mxu0 %v4372_v15  ;;  %v1527_v15 = vrot.slane %v1514_v5, %v1526_v7  ;;  %v3524_v7 = vld [vmem:[%s7053_s5 + $0x1c8] sm:$0xff] }
  0x86   : > { %4375 = vmatpush1.bf16.msra.mxu0 %v4374_v21 }
  0x87   : > { %4377 = vmatprep.subr.bf16.mxu0 %v4376_v23 }
  0x8a   : > { %4379 = vmatpush1.bf16.msra.mxu0 %v4378_v29 }
  0x8b   : > { %4381 = vmatprep.subr.bf16.mxu0 %v4380_v34 }
  0x8e   : > { %4383 = vmatpush1.bf16.msra.mxu0 %v4382_v41 }
  0x8f   : > { %4385 = vmatprep.subr.bf16.mxu0 %v4384_v43 }
  0x92   : > { %4387 = vmatpush1.bf16.msra.mxu0 %v4386_v48 }
  0xf7   : > { %v699_v14 = vpop.f32.mrb[0].mxu1 }
  0xf8   : > { %v3949_v18 = vpop.f32.mrb[1].mxu1 }
  0xfb   : > { %v704_v22 = vpop.f32.mrb[2].mxu1 }
  0xfc   : > { %v3952_v26 = vpop.f32.mrb[3].mxu1 }
  0xff   : > { %v709_v33 = vpop.f32.mrb[4].mxu1 }
 0x100   : > { %v3955_v37 = vpop.f32.mrb[5].mxu1 }
 0x103   : > { %v877_v42 = vpop.f32.mrb[6].mxu1 }
 0x104   : > { %v878_v46 = vadd.f32 %v877_v42, %v699_v14  ;;  %v3966_v47 = vpop.f32.mrb[7].mxu1  ;;  %v1523_v14 = vrot.slane %v1514_v5, %v1522_v6  ;;  %v3521_v5 = vld [vmem:[%s7053_s5 + $0x1b0] sm:$0xff] }
 0x107   : > { %v882_v49 = vpop.f32.mrb[8].mxu1 }
 0x108   : > { %v883_v50 = vadd.f32 %v882_v49, %v704_v22  ;;  %v3969_v51 = vpop.f32.mrb[9].mxu1 }
 0x10b   : > { %v887_v52 = vpop.f32.mrb[10].mxu1 }
 0x10c   : > { %v888_v53 = vadd.f32 %v887_v52, %v709_v33  ;;  %v3972_v54 = vpop.f32.mrb[11].mxu1 }
 0x10d   : > { %v1549_v54 = vld [vmem:[%s7051_s3] sm:$0xff] }
 0x10f   : > { %v1076_v55 = vpop.f32.mrb[12].mxu1 }
 0x110   : > { %v1092_v56 = vadd.f32 %v1076_v55, %v878_v46  ;;  %v3983_v57 = vpop.f32.mrb[13].mxu1 }
 0x111   : > { %v1550_v57 = vld [vmem:[%s7051_s3 + $0x8] sm:$0xf] }
 0x113   : > { %v1081_v58 = vpop.f32.mrb[14].mxu1 }
 0x114   : > { %v1095_v59 = vadd.f32 %v1081_v58, %v883_v50  ;;  %v3986_v60 = vpop.f32.mrb[15].mxu1  ;;  %v1775_v58 = vld [vmem:[%s7052_s4 + $0x208] sm:$0xff] }
 0x117   : > { %v1086_v61 = vpop.f32.mrb[16].mxu1 }
 0x118   : > { %v1098_v62 = vadd.f32 %v1086_v61, %v888_v53  ;;  %v3989_v63 = vpop.f32.mrb[17].mxu1  ;;  %v3516_v61 = vld [vmem:[%s7053_s5 + $0x188] sm:$0xff] }
 0x119   : > { %v3515_v63 = vld [vmem:[%s7053_s5 + $0x180] sm:$0xff] }
 0x11b   : > { %v1284_v12 = vpop.f32.mrb[18].mxu1 }
 0x11c   : > { %v1300_v31 = vadd.f32 %v1284_v12, %v1092_v56  ;;  %v4000_v32 = vpop.f32.mrb[19].mxu1  ;;  %v3517_v12 = vld [vmem:[%s7053_s5 + $0x190] sm:$0xff] }
 0x11d   : > { %v3522_v32 = vld [vmem:[%s7053_s5 + $0x1b8] sm:$0xff] }
 0x11f   : > { %v1289_v0 = vpop.f32.mrb[20].mxu1 }
 0x120   : > { %v1303_v1 = vadd.f32 %v1289_v0, %v1095_v59  ;;  %v4003_v2 = vpop.f32.mrb[21].mxu1  ;;  %v1777_v59 = vld [vmem:[%s7052_s4 + $0x218] sm:$0xff]  ;;  %v4422_v0 = vpack.c.bf16 %v3517_v12, %v3515_v63  ;;  %v1776_v63 = vld [vmem:[%s7052_s4 + $0x210] sm:$0xff] }
 0x121   : > { %v4388_v60 = vpack.c.bf16 %v1777_v59, %v1775_v58  ;;  %v3519_v2 = vld [vmem:[%s7053_s5 + $0x1a0] sm:$0xff]  ;;  %v1781_v12 = vld [vmem:[%s7052_s4 + $0x238] sm:$0xff] }
 0x122   : > { %v3551_v59 = vld [vmem:[%s7053_s5 + $0x2a0] sm:$0xff] }
 0x123   : > { %v1294_v8 = vpop.f32.mrb[22].mxu1  ;;  %4389 = vmatprep.subr.bf16.mxu0 %v4388_v60  ;;  %v3553_v60 = vld [vmem:[%s7053_s5 + $0x2b0] sm:$0xff] }
 0x124   : > { %v1306_v9 = vadd.f32 %v1294_v8, %v1098_v62  ;;  %v4006_v10 = vpop.f32.mrb[23].mxu1  ;;  %v3518_v62 = vld [vmem:[%s7053_s5 + $0x198] sm:$0xff] }
 0x125   : > { %v4420_v30 = vpack.c.bf16 %v3518_v62, %v3516_v61  ;;  %v3526_v8 = vld [vmem:[%s7053_s5 + $0x1d8] sm:$0xff]  ;;  %v4458_v61 = vpack.c.bf16 %v3553_v60, %v3551_v59  ;;  %v1774_v62 = vld [vmem:[%s7052_s4 + $0x200] sm:$0xff]  ;;  %v3560_v60 = vld [vmem:[%s7053_s5 + $0x2e8] sm:$0xff] }
 0x126   : > { %v4428_v10 = vpack.c.bf16 %v3526_v8, %v3524_v7  ;;  %v1783_v7 = vld [vmem:[%s7052_s4 + $0x248] sm:$0xff]  ;;  %v1785_v8 = vld [vmem:[%s7052_s4 + $0x258] sm:$0xff] }
 0x127   : > { %v1491_v16 = vpop.f32.mrb[24].mxu1  ;;  %v1408_v17 = vpop.f32.mrb[0].mxu0 }
 0x128   : > { %v1507_v18 = vadd.f32 %v1491_v16, %v1300_v31  ;;  %v1531_v19 = vadd.f32 %v1519_v11, %v1408_v17  ;;  %v1410_v20 = vpop.f32.mrb[1].mxu0  ;;  %v4017_v21 = vpop.f32.mrb[25].mxu1  ;;  %v3520_v31 = vld [vmem:[%s7053_s5 + $0x1a8] sm:$0xff]  ;;  %v3530_v16 = vld [vmem:[%s7053_s5 + $0x1f8] sm:$0xff] }
 0x129   : > { %v1532_v22 = vadd.f32 %v1523_v14, %v1410_v20  ;;  %v3529_v20 = vld [vmem:[%s7053_s5 + $0x1f0] sm:$0xff]  ;;  %v3532_v21 = vld [vmem:[%s7053_s5 + $0x208] sm:$0xff] }
 0x12a   : > { %v1533_v23 = vadd.f32 %v1527_v15, %v1507_v18  ;;  %4910 = vtanh.f32 %v1531_v19  ;;  %v3527_v19 = vld [vmem:[%s7053_s5 + $0x1e0] sm:$0xff] }
 0x12b   : > { %v1496_v24 = vpop.f32.mrb[26].mxu1  ;;  %v1414_v25 = vpop.f32.mrb[2].mxu0  ;;  %4912 = vtanh.f32 %v1532_v22  ;;  %v3534_v22 = vld [vmem:[%s7053_s5 + $0x218] sm:$0xff] }
 0x12c   : > { %v1510_v26 = vadd.f32 %v1496_v24, %v1303_v1  ;;  %v1534_v27 = vadd.f32 %v1519_v11, %v1414_v25  ;;  %v1416_v28 = vpop.f32.mrb[3].mxu0  ;;  %v4020_v29 = vpop.f32.mrb[27].mxu1  ;;  %4914 = vtanh.f32 %v1533_v23  ;;  %v4424_v1 = vpack.c.bf16 %v3522_v32, %v3520_v31  ;;  %v3531_v25 = vld [vmem:[%s7053_s5 + $0x200] sm:$0xff] }
 0x12d   : > { %v1535_v33 = vadd.f32 %v1523_v14, %v1416_v28  ;;  %v4434_v23 = vpack.c.bf16 %v3529_v20, %v3527_v19  ;;  %v4436_v24 = vpack.c.bf16 %v3534_v22, %v3532_v21  ;;  %v3538_v28 = vld [vmem:[%s7053_s5 + $0x238] sm:$0xff]  ;;  %v4390_v32 = vpack.c.bf16 %v1776_v63, %v1774_v62  ;;  %v1786_v22 = vld [vmem:[%s7052_s4 + $0x260] sm:$0xff] }
 0x12e   : > { %v1536_v34 = vadd.f32 %v1527_v15, %v1510_v26  ;;  %4916 = vtanh.f32 %v1534_v27  ;;  %v3533_v26 = vld [vmem:[%s7053_s5 + $0x210] sm:$0xff]  ;;  %v3536_v27 = vld [vmem:[%s7053_s5 + $0x228] sm:$0xff]  ;;  %v3559_v63 = vld [vmem:[%s7053_s5 + $0x2e0] sm:$0xff] }
 0x12f   : > { %4918 = vtanh.f32 %v1535_v33  ;;  %v1501_v35 = vpop.f32.mrb[28].mxu1  ;;  %v1420_v36 = vpop.f32.mrb[4].mxu0  ;;  %v4438_v29 = vpack.c.bf16 %v3533_v26, %v3531_v25  ;;  %v4440_v33 = vpack.c.bf16 %v3538_v28, %v3536_v27  ;;  %v1791_v25 = vld [vmem:[%s7052_s4 + $0x288] sm:$0xff]  ;;  %v1793_v26 = vld [vmem:[%s7052_s4 + $0x298] sm:$0xff] }
 0x130   : > { %4920 = vtanh.f32 %v1536_v34  ;;  %v1513_v37 = vadd.f32 %v1501_v35, %v1306_v9  ;;  %v1422_v39 = vpop.f32.mrb[5].mxu0  ;;  %v4023_v40 = vpop.f32.mrb[29].mxu1  ;;  %v1537_v42 = vadd.f32 %v1519_v11, %v1420_v36  ;;  %v4426_v9 = vpack.c.bf16 %v3521_v5, %v3519_v2  ;;  %v3523_v11 = vld [vmem:[%s7053_s5 + $0x1c0] sm:$0xff]  ;;  %v3537_v35 = vld [vmem:[%s7053_s5 + $0x230] sm:$0xff]  ;;  %v3540_v36 = vld [vmem:[%s7053_s5 + $0x248] sm:$0xff] }
 0x131   : > { %v1538_v41 = vadd.f32 %v1523_v14, %v1422_v39  ;;  %v3525_v14 = vld [vmem:[%s7053_s5 + $0x1d0] sm:$0xff]  ;;  %v3535_v34 = vld [vmem:[%s7053_s5 + $0x220] sm:$0xff]  ;;  %v4404_v28 = vpack.c.bf16 %v1793_v26, %v1791_v25  ;;  %v1967_v25 = vld [vmem:[%s7053_s5 + $0x38] sm:$0xff] }
 0x132   : > { %v1539_v44 = vadd.f32 %v1527_v15, %v1513_v37  ;;  %v3528_v15 = vld [vmem:[%s7053_s5 + $0x1e8] sm:$0xff]  ;;  %v4430_v17 = vpack.c.bf16 %v3525_v14, %v3523_v11  ;;  %v3542_v37 = vld [vmem:[%s7053_s5 + $0x258] sm:$0xff]  ;;  %v4442_v39 = vpack.c.bf16 %v3537_v35, %v3535_v34  ;;  %v1778_v2 = vld [vmem:[%s7052_s4 + $0x220] sm:$0xff]  ;;  %v4396_v11 = vpack.c.bf16 %v1785_v8, %v1783_v7 }
 0x133   : > { %4922 = vtanh.f32 %v1538_v41  ;;  %v4432_v18 = vpack.c.bf16 %v3530_v16, %v3528_v15  ;;  %v4444_v40 = vpack.c.bf16 %v3542_v37, %v3540_v36  ;;  %v3539_v41 = vld [vmem:[%s7053_s5 + $0x240] sm:$0xff]  ;;  %v1780_v5 = vld [vmem:[%s7052_s4 + $0x230] sm:$0xff]  ;;  %v1795_v34 = vld [vmem:[%s7052_s4 + $0x2a8] sm:$0xff] }
 0x134   : > { %v4911_v43 = vpop.eup %4910  ;;  %4924 = vtanh.f32 %v1537_v42  ;;  %v3541_v42 = vld [vmem:[%s7053_s5 + $0x250] sm:$0xff]  ;;  %v1782_v14 = vld [vmem:[%s7052_s4 + $0x240] sm:$0xff]  ;;  %v1797_v35 = vld [vmem:[%s7052_s4 + $0x2b8] sm:$0xff] }
 0x135   : > { %v4913_v45 = vpop.eup %4912  ;;  %4926 = vtanh.f32 %v1539_v44  ;;  %v3546_v44 = vld [vmem:[%s7053_s5 + $0x278] sm:$0xff]  ;;  %v1784_v15 = vld [vmem:[%s7052_s4 + $0x250] sm:$0xff]  ;;  %v4408_v37 = vpack.c.bf16 %v1797_v35, %v1795_v34 }
 0x136   : > { %v4915_v46 = vpop.eup %4914  ;;  %v4398_v19 = vpack.c.bf16 %v1784_v15, %v1782_v14 }
 0x138   : > { %v4917_v47 = vpop.eup %4916 }
 0x139   : > { %v4919_v48 = vpop.eup %4918  ;;  %v4318_v49 = vpack.c.bf16 %v4917_v47, %v4911_v43  ;;  %v3544_v43 = vld [vmem:[%s7053_s5 + $0x268] sm:$0xff]  ;;  %v3543_v47 = vld [vmem:[%s7053_s5 + $0x260] sm:$0xff] }
 0x13a   : > { %v4921_v50 = vpop.eup %4920  ;;  %v4316_v51 = vpack.c.bf16 %v4919_v48, %v4913_v45  ;;  %v4446_v45 = vpack.c.bf16 %v3541_v42, %v3539_v41  ;;  %v3545_v48 = vld [vmem:[%s7053_s5 + $0x270] sm:$0xff]  ;;  %v1799_v41 = vld [vmem:[%s7052_s4 + $0x2c8] sm:$0xff]  ;;  %v1801_v42 = vld [vmem:[%s7052_s4 + $0x2d8] sm:$0xff] }
 0x13b   : > { %v4320_v52 = vpack.c.bf16 %v4921_v50, %v4915_v46  ;;  %v4448_v46 = vpack.c.bf16 %v3546_v44, %v3544_v43  ;;  %v3550_v50 = vld [vmem:[%s7053_s5 + $0x298] sm:$0xff]  ;;  %v4412_v44 = vpack.c.bf16 %v1801_v42, %v1799_v41  ;;  %v1966_v41 = vld [vmem:[%s7053_s5 + $0x30] sm:$0xff] }
 0x13c   : > { %4317 = vmatprep.subr.bf16.mxu1 %v4316_v51  ;;  %v4450_v51 = vpack.c.bf16 %v3545_v48, %v3543_v47  ;;  %v1803_v47 = vld [vmem:[%s7052_s4 + $0x2e8] sm:$0xff]  ;;  %v1805_v48 = vld [vmem:[%s7052_s4 + $0x2f8] sm:$0xff] }
 0x13d   : > { %v4923_v53 = vpop.eup %4922  ;;  %4319 = vmatpush1.bf16.msra.mxu1 %v4318_v49  ;;  %v3548_v49 = vld [vmem:[%s7053_s5 + $0x288] sm:$0xff] }
 0x13e   : > { %1562 = vmatprep.subr.mxu1 %v4923_v53  ;;  %v4925_v55 = vpop.eup %4924  ;;  %v3547_v53 = vld [vmem:[%s7053_s5 + $0x280] sm:$0xff] }
 0x13f   : > { %v4927_v56 = vpop.eup %4926 }
 0x141   : > { %1563 = vmatpush1.msra.mxu1 %v4925_v55  ;;  %v3552_v55 = vld [vmem:[%s7053_s5 + $0x2a8] sm:$0xff] }
 0x142   : > { %3511 = vmatmul.mubr.msk.f32.vlgmr.msra.gmra.mrb[30].mxu1 %vm1551_vm8, %v1549_v54  ;;  %4321 = vmatprep.subr.bf16.mxu1 %v4320_v52 }
 0x143   : > { %4323 = vmatpush3.bf16.msra.mxu1 %v4320_v52  ;;  %1628 = vmatprep.mubr.f32.mxu1 %v5003_v13  ;;  %v4452_v52 = vpack.c.bf16 %v3550_v50, %v3548_v49  ;;  %v4416_v50 = vpack.c.bf16 %v1805_v48, %v1803_v47 }
 0x144   : > { %4028 = vmatprep.subr.mxu1 %v4927_v56 }
 0x146   : > { %3512 = vmatmul.mubr.msk.f32.gmra.mrb[32].mxu1 %vm1551_vm8, %v1550_v57 }
 0x147   : > { %4029 = vmatpush3.msra.mxu1 %v4927_v56  ;;  %4030 = vmatprep.mubr.msk.f32.mxu1 %vm1551_vm8, %v1549_v54  ;;  %v3549_v54 = vld [vmem:[%s7053_s5 + $0x290] sm:$0xff]  ;;  %v3554_v56 = vld [vmem:[%s7053_s5 + $0x2b8] sm:$0xff] }
 0x148   : > { %4421 = vmatprep.subr.bf16.mxu1 %v4420_v30  ;;  %v4456_v58 = vpack.c.bf16 %v3554_v56, %v3552_v55  ;;  %v1779_v30 = vld [vmem:[%s7052_s4 + $0x228] sm:$0xff]  ;;  %v3558_v55 = vld [vmem:[%s7053_s5 + $0x2d8] sm:$0xff] }
 0x14a   : > { %4031 = vmatmul.mubr.msk.f32.vlgmr.msra.gmra.mrb[34].mxu1 %vm1551_vm8, %v1550_v57  ;;  %v4454_v57 = vpack.c.bf16 %v3549_v54, %v3547_v53  ;;  %v3556_v54 = vld [vmem:[%s7053_s5 + $0x2c8] sm:$0xff] }
 0x14b   : > { %4423 = vmatpush1.bf16.msra.mxu1 %v4422_v0  ;;  %v4460_v56 = vpack.c.bf16 %v3558_v55, %v3556_v54 }
 0x14c   : > { %4425 = vmatprep.subr.bf16.mxu1 %v4424_v1  ;;  %v4392_v1 = vpack.c.bf16 %v1781_v12, %v1779_v30  ;;  %v3561_v30 = vld [vmem:[%s7053_s5 + $0x2f0] sm:$0xff] }
 0x14d   : > { %v4466_v12 = vpack.c.bf16 %v3561_v30, %v3559_v63  ;;  %v1978_v63 = vld [vmem:[%s7053_s5 + $0x90] sm:$0xff]  ;;  %v1981_v30 = vld [vmem:[%s7053_s5 + $0xa8] sm:$0xff] }
 0x14f   : > { %4427 = vmatpush1.bf16.msra.mxu1 %v4426_v9  ;;  %v4394_v9 = vpack.c.bf16 %v1780_v5, %v1778_v2  ;;  %v1960_v2 = vld [vmem:[%s7053_s5] sm:$0xff]  ;;  %v1962_v5 = vld [vmem:[%s7053_s5 + $0x10] sm:$0xff] }
 0x150   : > { %4429 = vmatprep.subr.bf16.mxu1 %v4428_v10 }
 0x153   : > { %4431 = vmatpush1.bf16.msra.mxu1 %v4430_v17  ;;  %v1787_v17 = vld [vmem:[%s7052_s4 + $0x268] sm:$0xff] }
 0x154   : > { %4433 = vmatprep.subr.bf16.mxu1 %v4432_v18  ;;  %v1789_v18 = vld [vmem:[%s7052_s4 + $0x278] sm:$0xff] }
 0x155   : > { %v4400_v21 = vpack.c.bf16 %v1789_v18, %v1787_v17 }
 0x157   : > { %4435 = vmatpush1.bf16.msra.mxu1 %v4434_v23  ;;  %v1788_v23 = vld [vmem:[%s7052_s4 + $0x270] sm:$0xff] }
 0x158   : > { %4437 = vmatprep.subr.bf16.mxu1 %v4436_v24  ;;  %v4402_v27 = vpack.c.bf16 %v1788_v23, %v1786_v22 }
 0x15b   : > { %4439 = vmatpush1.bf16.msra.mxu1 %v4438_v29  ;;  %v1790_v29 = vld [vmem:[%s7052_s4 + $0x280] sm:$0xff] }
 0x15c   : > { %4441 = vmatprep.subr.bf16.mxu1 %v4440_v33  ;;  %v1792_v33 = vld [vmem:[%s7052_s4 + $0x290] sm:$0xff] }
 0x15d   : > { %v4406_v36 = vpack.c.bf16 %v1792_v33, %v1790_v29 }
 0x15f   : > { %4443 = vmatpush1.bf16.msra.mxu1 %v4442_v39  ;;  %v1794_v39 = vld [vmem:[%s7052_s4 + $0x2a0] sm:$0xff] }
 0x160   : > { %4445 = vmatprep.subr.bf16.mxu1 %v4444_v40  ;;  %v1796_v40 = vld [vmem:[%s7052_s4 + $0x2b0] sm:$0xff] }
 0x161   : > { %v4410_v43 = vpack.c.bf16 %v1796_v40, %v1794_v39  ;;  %v1964_v40 = vld [vmem:[%s7053_s5 + $0x20] sm:$0xff] }
 0x162   : > { %v4474_v48 = vpack.c.bf16 %v1966_v41, %v1964_v40 }
 0x163   : > { %4447 = vmatpush1.bf16.msra.mxu1 %v4446_v45  ;;  %v1798_v45 = vld [vmem:[%s7052_s4 + $0x2c0] sm:$0xff] }
 0x164   : > { %4449 = vmatprep.subr.bf16.mxu1 %v4448_v46  ;;  %v1800_v46 = vld [vmem:[%s7052_s4 + $0x2d0] sm:$0xff] }
 0x165   : > { %v4414_v49 = vpack.c.bf16 %v1800_v46, %v1798_v45  ;;  %v1971_v45 = vld [vmem:[%s7053_s5 + $0x58] sm:$0xff] }
 0x167   : > { %4451 = vmatpush1.bf16.msra.mxu1 %v4450_v51  ;;  %v1802_v51 = vld [vmem:[%s7052_s4 + $0x2e0] sm:$0xff] }
 0x168   : > { %4453 = vmatprep.subr.bf16.mxu1 %v4452_v52  ;;  %v1804_v52 = vld [vmem:[%s7052_s4 + $0x2f0] sm:$0xff] }
 0x169   : > { %v4418_v53 = vpack.c.bf16 %v1804_v52, %v1802_v51  ;;  %v1970_v51 = vld [vmem:[%s7053_s5 + $0x50] sm:$0xff]  ;;  %v1973_v52 = vld [vmem:[%s7053_s5 + $0x68] sm:$0xff] }
 0x16b   : > { %4455 = vmatpush1.bf16.msra.mxu1 %v4454_v57  ;;  %v3555_v57 = vld [vmem:[%s7053_s5 + $0x2c0] sm:$0xff] }
 0x16c   : > { %4457 = vmatprep.subr.bf16.mxu1 %v4456_v58  ;;  %v3557_v58 = vld [vmem:[%s7053_s5 + $0x2d0] sm:$0xff] }
 0x16d   : > { %v4462_v59 = vpack.c.bf16 %v3557_v58, %v3555_v57  ;;  %v1974_v57 = vld [vmem:[%s7053_s5 + $0x70] sm:$0xff]  ;;  %v1977_v58 = vld [vmem:[%s7053_s5 + $0x88] sm:$0xff] }
 0x16f   : > { %4459 = vmatpush1.bf16.msra.mxu1 %v4458_v61  ;;  %v3562_v61 = vld [vmem:[%s7053_s5 + $0x2f8] sm:$0xff] }
 0x170   : > { %4461 = vmatprep.subr.bf16.mxu1 %v4460_v56  ;;  %v4464_v62 = vpack.c.bf16 %v3562_v61, %v3560_v60  ;;  %v1972_v56 = vld [vmem:[%s7053_s5 + $0x60] sm:$0xff] }
 0x171   : > { %v4482_v60 = vpack.c.bf16 %v1974_v57, %v1972_v56 }
 0x173   : > { %4463 = vmatpush1.bf16.msra.mxu1 %v4462_v59  ;;  %v1979_v59 = vld [vmem:[%s7053_s5 + $0x98] sm:$0xff] }
 0x174   : > { %4465 = vmatprep.subr.bf16.mxu1 %v4464_v62  ;;  %v4484_v61 = vpack.c.bf16 %v1979_v59, %v1977_v58  ;;  %v1976_v62 = vld [vmem:[%s7053_s5 + $0x80] sm:$0xff]  ;;  %v3567_v59 = vld [vmem:[%s7053_s5 + $0x310] sm:$0xff] }
 0x175   : > { %v3565_v58 = vld [vmem:[%s7053_s5 + $0x300] sm:$0xff] }
 0x177   : > { %4467 = vmatpush1.bf16.msra.mxu1 %v4466_v12  ;;  %v1983_v12 = vld [vmem:[%s7053_s5 + $0xb8] sm:$0xff] }
 0x215   : > { %v1624_v31 = vpop.f32.mrb[30].mxu1 }
 0x216   : > { %v1626_v0 = vpop.f32.mrb[31].mxu1 }
 0x217   : > { %1870 = vmatprep.mubr.f32.mxu0 %v1626_v0 }
 0x218   : > { %1871 = vmatmul.mubr.f32.vlgmr.msra.gmra.mrb[6].mxu0 %v1624_v31  ;;  %v1961_v31 = vld [vmem:[%s7053_s5 + $0x8] sm:$0xff] }
 0x219   : > { %4391 = vmatpush1.bf16.msra.mxu0 %v4390_v32  ;;  %v1630_v10 = vpop.f32.mrb[32].mxu1  ;;  %v1963_v32 = vld [vmem:[%s7053_s5 + $0x18] sm:$0xff] }
 0x21a   : > { %4393 = vmatprep.subr.bf16.mxu0 %v4392_v1  ;;  %v1632_v16 = vpop.f32.mrb[33].mxu1  ;;  %v4468_v0 = vpack.c.bf16 %v1963_v32, %v1961_v31  ;;  %v4486_v31 = vpack.c.bf16 %v1978_v63, %v1976_v62  ;;  %v4488_v32 = vpack.c.bf16 %v1983_v12, %v1981_v30  ;;  %v4518_v62 = vpack.c.bf16 %v3567_v59, %v3565_v58  ;;  %v3569_v30 = vld [vmem:[%s7053_s5 + $0x320] sm:$0xff]  ;;  %v3571_v12 = vld [vmem:[%s7053_s5 + $0x330] sm:$0xff] }
 0x21b   : > { %1876 = vmatprep.mubr.f32.mxu0 %v1632_v16  ;;  %v1965_v16 = vld [vmem:[%s7053_s5 + $0x28] sm:$0xff]  ;;  %v3601_v58 = vld [vmem:[%s7053_s5 + $0x420] sm:$0xff]  ;;  %v3603_v59 = vld [vmem:[%s7053_s5 + $0x430] sm:$0xff] }
 0x21c   : > { %1877 = vmatmul.mubr.f32.gmra.mrb[8].mxu0 %v1630_v10  ;;  %4469 = vmatprep.subr.bf16.mxu1 %v4468_v0  ;;  %v4472_v39 = vpack.c.bf16 %v1967_v25, %v1965_v16  ;;  %v1980_v0 = vld [vmem:[%s7053_s5 + $0xa0] sm:$0xff]  ;;  %v1994_v25 = vld [vmem:[%s7053_s5 + $0x110] sm:$0xff] }
 0x21d   : > { %4395 = vmatpush1.bf16.msra.mxu0 %v4394_v9  ;;  %v4032_v20 = vpop.f32.mrb[34].mxu1  ;;  %1947 = vmatprep.mubr.f32.mxu0 %v5003_v13  ;;  %v4470_v9 = vpack.c.bf16 %v1962_v5, %v1960_v2  ;;  %v1982_v2 = vld [vmem:[%s7053_s5 + $0xb0] sm:$0xff]  ;;  %v1985_v5 = vld [vmem:[%s7053_s5 + $0xc8] sm:$0xff] }
 0x21e   : > { %4397 = vmatprep.subr.bf16.mxu0 %v4396_v11  ;;  %v1701_v24 = vpop.f32.mrb[35].mxu1 }
 0x221   : > { %4399 = vmatpush1.bf16.msra.mxu0 %v4398_v19 }
 0x222   : > { %4401 = vmatprep.subr.bf16.mxu0 %v4400_v21 }
 0x225   : > { %4403 = vmatpush1.bf16.msra.mxu0 %v4402_v27 }
 0x226   : > { %4405 = vmatprep.subr.bf16.mxu0 %v4404_v28 }
 0x229   : > { %4407 = vmatpush1.bf16.msra.mxu0 %v4406_v36 }
 0x22a   : > { %4409 = vmatprep.subr.bf16.mxu0 %v4408_v37 }
 0x22d   : > { %4411 = vmatpush1.bf16.msra.mxu0 %v4410_v43 }
 0x22e   : > { %4413 = vmatprep.subr.bf16.mxu0 %v4412_v44  ;;  %v1969_v44 = vld [vmem:[%s7053_s5 + $0x48] sm:$0xff] }
 0x231   : > { %4415 = vmatpush1.bf16.msra.mxu0 %v4414_v49  ;;  %v4476_v49 = vpack.c.bf16 %v1971_v45, %v1969_v44  ;;  %v2000_v44 = vld [vmem:[%s7053_s5 + $0x140] sm:$0xff]  ;;  %v2002_v45 = vld [vmem:[%s7053_s5 + $0x150] sm:$0xff] }
 0x232   : > { %4417 = vmatprep.subr.bf16.mxu0 %v4416_v50  ;;  %v1968_v50 = vld [vmem:[%s7053_s5 + $0x40] sm:$0xff] }
 0x233   : > { %v4478_v54 = vpack.c.bf16 %v1970_v51, %v1968_v50  ;;  %v4510_v50 = vpack.c.bf16 %v2002_v45, %v2000_v44  ;;  %v3593_v44 = vld [vmem:[%s7053_s5 + $0x3e0] sm:$0xff]  ;;  %v3595_v45 = vld [vmem:[%s7053_s5 + $0x3f0] sm:$0xff] }
 0x235   : > { %4419 = vmatpush1.bf16.msra.mxu0 %v4418_v53  ;;  %v1975_v53 = vld [vmem:[%s7053_s5 + $0x78] sm:$0xff] }
 0x236   : > { %v4480_v55 = vpack.c.bf16 %v1975_v53, %v1973_v52  ;;  %v2004_v52 = vld [vmem:[%s7053_s5 + $0x160] sm:$0xff]  ;;  %v2006_v53 = vld [vmem:[%s7053_s5 + $0x170] sm:$0xff] }
 0x237   : > { %v4514_v56 = vpack.c.bf16 %v2006_v53, %v2004_v52  ;;  %v3597_v52 = vld [vmem:[%s7053_s5 + $0x400] sm:$0xff]  ;;  %v3599_v53 = vld [vmem:[%s7053_s5 + $0x410] sm:$0xff] }
 0x238   : > { %1948 = vmatmul.mubr.f32.vlgmr.msra.gmra.mrb[6].mxu0 %v1701_v24 }
 0x239   : > { %1953 = vmatprep.mubr.f32.mxu0 %v5003_v13 }
 0x23c   : > { %1954 = vmatmul.mubr.f32.gmra.mrb[8].mxu0 %v4032_v20 }
 0x23d   : > { %2693 = vmatprep.mubr.f32.mxu0 %v5003_v13 }
 0x30b   : > { %v5943_v1 = vpop.f32.mrb[6].mxu0 }
 0x30c   : > { %v1951_v7 = vpop.f32.mrb[7].mxu0  ;;  %v2061_v8 = vrot.slane %v5943_v1, 1  ;;  %v2264_v10 = vrot.slane %v5943_v1, 2  ;;  %v2395_v11 = vrot.slane %v5943_v1, 3  ;;  %v2526_v36 = vrot.slane %v5943_v1, 4 }
 0x30d   : > { %v2064_v15 = vrot.slane %v1951_v7, 1  ;;  %v2267_v17 = vrot.slane %v1951_v7, 2  ;;  %v2398_v18 = vrot.slane %v1951_v7, 3  ;;  %v2529_v19 = vrot.slane %v1951_v7, 4 }
 0x30f   : > { %v1955_v14 = vpop.f32.mrb[8].mxu0 }
 0x310   : > { %v2062_v20 = vrot.slane %v1955_v14, 1  ;;  %v2265_v21 = vrot.slane %v1955_v14, 2  ;;  %v2396_v22 = vrot.slane %v1955_v14, 3  ;;  %v2527_v23 = vrot.slane %v1955_v14, 4  ;;  %v1957_v24 = vpop.f32.mrb[9].mxu0  ;;  %v1989_v14 = vld [vmem:[%s7053_s5 + $0xe8] sm:$0xff] }
 0x311   : > { %v2065_v26 = vrot.slane %v1957_v24, 1  ;;  %v2268_v27 = vrot.slane %v1957_v24, 2  ;;  %v2399_v28 = vrot.slane %v1957_v24, 3  ;;  %v2530_v29 = vrot.slane %v1957_v24, 4  ;;  %v1992_v24 = vld [vmem:[%s7053_s5 + $0x100] sm:$0xff] }
 0x312   : > { %v2063_v33 = vsel %vm525_vm4, %v2061_v8, %v2062_v20  ;;  %v5962_v34 = vsel %vm904_vm6, %v2264_v10, %v2265_v21  ;;  %v5965_v35 = vsel %vm1112_vm7, %v2395_v11, %v2396_v22  ;;  %v5992_v47 = vsel %vm540_vm0, %v2526_v36, %v2527_v23  ;;  %v1984_v10 = vld [vmem:[%s7053_s5 + $0xc0] sm:$0xff]  ;;  %v1986_v11 = vld [vmem:[%s7053_s5 + $0xd0] sm:$0xff]  ;;  %v1993_v20 = vld [vmem:[%s7053_s5 + $0x108] sm:$0xff] }
 0x313   : > { %v2066_v37 = vsel %vm525_vm4, %v2064_v15, %v2065_v26  ;;  %v5976_v42 = vsel %vm904_vm6, %v2267_v17, %v2268_v27  ;;  %v5979_v43 = vsel %vm1112_vm7, %v2398_v18, %v2399_v28  ;;  %v5989_v46 = vsel %vm540_vm0, %v2529_v19, %v2530_v29  ;;  %v1991_v15 = vld [vmem:[%s7053_s5 + $0xf8] sm:$0xff]  ;;  %v1988_v18 = vld [vmem:[%s7053_s5 + $0xe0] sm:$0xff]  ;;  %v1990_v19 = vld [vmem:[%s7053_s5 + $0xf0] sm:$0xff] }
 0x314   : > { %3563 = vmatprep.mubr.msk.f32.mxu1 %vm2068_vm9, %v2066_v37  ;;  %v4490_v8 = vpack.c.bf16 %v1982_v2, %v1980_v0  ;;  %v4494_v16 = vpack.c.bf16 %v1986_v11, %v1984_v10  ;;  %v4496_v17 = vpack.c.bf16 %v1991_v15, %v1989_v14  ;;  %v1995_v21 = vld [vmem:[%s7053_s5 + $0x118] sm:$0xff]  ;;  %v4498_v22 = vpack.c.bf16 %v1990_v19, %v1988_v18  ;;  %v1997_v26 = vld [vmem:[%s7053_s5 + $0x128] sm:$0xff]  ;;  %v1998_v36 = vld [vmem:[%s7053_s5 + $0x130] sm:$0xff] }
 0x315   : > { %2136 = vmatmul.mubr.f32.vlgmr.msra.gmra.mrb[36].mxu1 %v2063_v33  ;;  %v4500_v23 = vpack.c.bf16 %v1995_v21, %v1993_v20  ;;  %v1999_v27 = vld [vmem:[%s7053_s5 + $0x138] sm:$0xff]  ;;  %v4502_v28 = vpack.c.bf16 %v1994_v25, %v1992_v24  ;;  %v1996_v33 = vld [vmem:[%s7053_s5 + $0x120] sm:$0xff]  ;;  %v2001_v37 = vld [vmem:[%s7053_s5 + $0x148] sm:$0xff]  ;;  %v4522_v0 = vpack.c.bf16 %v3571_v12, %v3569_v30 }
 0x316   : > { %4471 = vmatpush1.bf16.msra.mxu1 %v4470_v9  ;;  %3564 = vmatprep.mubr.msk.f32.mxu1 %vm2068_vm9, %v1951_v7  ;;  %v1987_v7 = vld [vmem:[%s7053_s5 + $0xd8] sm:$0xff]  ;;  %v4504_v29 = vpack.c.bf16 %v1999_v27, %v1997_v26  ;;  %v4506_v40 = vpack.c.bf16 %v1998_v36, %v1996_v33  ;;  %v3577_v10 = vld [vmem:[%s7053_s5 + $0x360] sm:$0xff]  ;;  %v3579_v11 = vld [vmem:[%s7053_s5 + $0x370] sm:$0xff] }
 0x317   : > { %4473 = vmatprep.subr.bf16.mxu1 %v4472_v39  ;;  %v4492_v9 = vpack.c.bf16 %v1987_v7, %v1985_v5  ;;  %v2003_v39 = vld [vmem:[%s7053_s5 + $0x158] sm:$0xff]  ;;  %v3573_v5 = vld [vmem:[%s7053_s5 + $0x340] sm:$0xff]  ;;  %v3575_v7 = vld [vmem:[%s7053_s5 + $0x350] sm:$0xff] }
 0x318   : > { %v4508_v41 = vpack.c.bf16 %v2003_v39, %v2001_v37  ;;  %v3582_v14 = vld [vmem:[%s7053_s5 + $0x388] sm:$0xff]  ;;  %v3584_v15 = vld [vmem:[%s7053_s5 + $0x398] sm:$0xff]  ;;  %v3581_v18 = vld [vmem:[%s7053_s5 + $0x380] sm:$0xff] }
 0x319   : > { %v3583_v19 = vld [vmem:[%s7053_s5 + $0x390] sm:$0xff]  ;;  %v3586_v20 = vld [vmem:[%s7053_s5 + $0x3a8] sm:$0xff]  ;;  %v3588_v21 = vld [vmem:[%s7053_s5 + $0x3b8] sm:$0xff] }
 0x31a   : > { %4475 = vmatpush1.bf16.msra.mxu1 %v4474_v48  ;;  %v2005_v48 = vld [vmem:[%s7053_s5 + $0x168] sm:$0xff]  ;;  %v3585_v24 = vld [vmem:[%s7053_s5 + $0x3a0] sm:$0xff]  ;;  %v3587_v25 = vld [vmem:[%s7053_s5 + $0x3b0] sm:$0xff] }
 0x31b   : > { %4477 = vmatprep.subr.bf16.mxu1 %v4476_v49  ;;  %v2007_v49 = vld [vmem:[%s7053_s5 + $0x178] sm:$0xff]  ;;  %v3590_v26 = vld [vmem:[%s7053_s5 + $0x3c8] sm:$0xff]  ;;  %v3589_v33 = vld [vmem:[%s7053_s5 + $0x3c0] sm:$0xff] }
 0x31c   : > { %v4512_v51 = vpack.c.bf16 %v2007_v49, %v2005_v48  ;;  %v3592_v27 = vld [vmem:[%s7053_s5 + $0x3d8] sm:$0xff]  ;;  %v3591_v36 = vld [vmem:[%s7053_s5 + $0x3d0] sm:$0xff]  ;;  %v3594_v37 = vld [vmem:[%s7053_s5 + $0x3e8] sm:$0xff] }
 0x31d   : > { %v3596_v39 = vld [vmem:[%s7053_s5 + $0x3f8] sm:$0xff]  ;;  %v3598_v48 = vld [vmem:[%s7053_s5 + $0x408] sm:$0xff]  ;;  %v3605_v30 = vld [vmem:[%s7053_s5 + $0x440] sm:$0xff] }
 0x31e   : > { %4479 = vmatpush1.bf16.msra.mxu1 %v4478_v54  ;;  %v3566_v54 = vld [vmem:[%s7053_s5 + $0x308] sm:$0xff]  ;;  %v3600_v49 = vld [vmem:[%s7053_s5 + $0x418] sm:$0xff]  ;;  %v3607_v12 = vld [vmem:[%s7053_s5 + $0x450] sm:$0xff] }
 0x31f   : > { %4481 = vmatprep.subr.bf16.mxu1 %v4480_v55  ;;  %v3568_v55 = vld [vmem:[%s7053_s5 + $0x318] sm:$0xff] }
 0x320   : > { %v4516_v57 = vpack.c.bf16 %v3568_v55, %v3566_v54  ;;  %v3602_v54 = vld [vmem:[%s7053_s5 + $0x428] sm:$0xff]  ;;  %v3604_v55 = vld [vmem:[%s7053_s5 + $0x438] sm:$0xff] }
 0x322   : > { %4483 = vmatpush1.bf16.msra.mxu1 %v4482_v60  ;;  %v3570_v60 = vld [vmem:[%s7053_s5 + $0x328] sm:$0xff] }
 0x323   : > { %4485 = vmatprep.subr.bf16.mxu1 %v4484_v61  ;;  %v3572_v61 = vld [vmem:[%s7053_s5 + $0x338] sm:$0xff] }
 0x324   : > { %v4520_v63 = vpack.c.bf16 %v3572_v61, %v3570_v60  ;;  %v3606_v60 = vld [vmem:[%s7053_s5 + $0x448] sm:$0xff]  ;;  %v3608_v61 = vld [vmem:[%s7053_s5 + $0x458] sm:$0xff] }
 0x326   : > { %4487 = vmatpush1.bf16.msra.mxu1 %v4486_v31  ;;  %v3574_v31 = vld [vmem:[%s7053_s5 + $0x348] sm:$0xff] }
 0x327   : > { %4489 = vmatprep.subr.bf16.mxu1 %v4488_v32  ;;  %v3576_v32 = vld [vmem:[%s7053_s5 + $0x358] sm:$0xff] }
 0x328   : > { %v4524_v2 = vpack.c.bf16 %v3576_v32, %v3574_v31  ;;  %v3610_v31 = vld [vmem:[%s7053_s5 + $0x468] sm:$0xff]  ;;  %v3612_v32 = vld [vmem:[%s7053_s5 + $0x478] sm:$0xff] }
 0x32a   : > { %4491 = vmatpush1.bf16.msra.mxu1 %v4490_v8  ;;  %v3578_v8 = vld [vmem:[%s7053_s5 + $0x368] sm:$0xff] }
 0x32b   : > { %4493 = vmatprep.subr.bf16.mxu1 %v4492_v9 }
 0x32e   : > { %4495 = vmatpush1.bf16.msra.mxu1 %v4494_v16  ;;  %v4530_v16 = vpack.c.bf16 %v3579_v11, %v3577_v10  ;;  %v3614_v10 = vld [vmem:[%s7053_s5 + $0x480] sm:$0xff]  ;;  %v3616_v11 = vld [vmem:[%s7053_s5 + $0x490] sm:$0xff] }
 0x32f   : > { %4497 = vmatprep.subr.bf16.mxu1 %v4496_v17  ;;  %v4532_v17 = vpack.c.bf16 %v3584_v15, %v3582_v14  ;;  %v3619_v14 = vld [vmem:[%s7053_s5 + $0x4a8] sm:$0xff]  ;;  %v3621_v15 = vld [vmem:[%s7053_s5 + $0x4b8] sm:$0xff] }
 0x332   : > { %4499 = vmatpush1.bf16.msra.mxu1 %v4498_v22  ;;  %v4534_v22 = vpack.c.bf16 %v3583_v19, %v3581_v18  ;;  %v3618_v18 = vld [vmem:[%s7053_s5 + $0x4a0] sm:$0xff]  ;;  %v3620_v19 = vld [vmem:[%s7053_s5 + $0x4b0] sm:$0xff] }
 0x333   : > { %4501 = vmatprep.subr.bf16.mxu1 %v4500_v23  ;;  %v4536_v23 = vpack.c.bf16 %v3588_v21, %v3586_v20  ;;  %v3623_v20 = vld [vmem:[%s7053_s5 + $0x4c8] sm:$0xff]  ;;  %v3625_v21 = vld [vmem:[%s7053_s5 + $0x4d8] sm:$0xff] }
 0x336   : > { %4503 = vmatpush1.bf16.msra.mxu1 %v4502_v28  ;;  %v4538_v28 = vpack.c.bf16 %v3587_v25, %v3585_v24  ;;  %v3622_v24 = vld [vmem:[%s7053_s5 + $0x4c0] sm:$0xff]  ;;  %v3624_v25 = vld [vmem:[%s7053_s5 + $0x4d0] sm:$0xff] }
 0x337   : > { %4505 = vmatprep.subr.bf16.mxu1 %v4504_v29  ;;  %v4540_v29 = vpack.c.bf16 %v3592_v27, %v3590_v26  ;;  %v3627_v26 = vld [vmem:[%s7053_s5 + $0x4e8] sm:$0xff] }
 0x33a   : > { %4507 = vmatpush1.bf16.msra.mxu1 %v4506_v40  ;;  %v4542_v40 = vpack.c.bf16 %v3591_v36, %v3589_v33  ;;  %v3631_v33 = vld [vmem:[%s7053_s5 + $0x508] sm:$0xff]  ;;  %v3633_v36 = vld [vmem:[%s7053_s5 + $0x518] sm:$0xff] }
 0x33b   : > { %4509 = vmatprep.subr.bf16.mxu1 %v4508_v41  ;;  %v4544_v41 = vpack.c.bf16 %v3596_v39, %v3594_v37  ;;  %v4580_v39 = vpack.c.bf16 %v3633_v36, %v3631_v33 }
 0x33e   : > { %4511 = vmatpush1.bf16.msra.mxu1 %v4510_v50  ;;  %v4546_v50 = vpack.c.bf16 %v3595_v45, %v3593_v44  ;;  %v3635_v44 = vld [vmem:[%s7053_s5 + $0x528] sm:$0xff]  ;;  %v3637_v45 = vld [vmem:[%s7053_s5 + $0x538] sm:$0xff] }
 0x33f   : > { %4513 = vmatprep.subr.bf16.mxu1 %v4512_v51  ;;  %v4548_v51 = vpack.c.bf16 %v3600_v49, %v3598_v48  ;;  %v4584_v49 = vpack.c.bf16 %v3637_v45, %v3635_v44 }
 0x342   : > { %4515 = vmatpush1.bf16.msra.mxu1 %v4514_v56  ;;  %v4550_v56 = vpack.c.bf16 %v3599_v53, %v3597_v52  ;;  %v3639_v52 = vld [vmem:[%s7053_s5 + $0x548] sm:$0xff]  ;;  %v3641_v53 = vld [vmem:[%s7053_s5 + $0x558] sm:$0xff] }
 0x343   : > { %4517 = vmatprep.subr.bf16.mxu1 %v4516_v57  ;;  %v4552_v57 = vpack.c.bf16 %v3604_v55, %v3602_v54  ;;  %v4588_v55 = vpack.c.bf16 %v3641_v53, %v3639_v52  ;;  %v3675_v52 = vld [vmem:[%s7053_s5 + $0x660] sm:$0xff]  ;;  %v3677_v53 = vld [vmem:[%s7053_s5 + $0x670] sm:$0xff] }
 0x345   : > { %2209 = vmatmul.mubr.f32.vlgmr.msra.gmra.mrb[36].mxu1 %v5943_v1  ;;  %v3580_v1 = vld [vmem:[%s7053_s5 + $0x378] sm:$0xff] }
 0x346   : > { %4519 = vmatpush1.bf16.msra.mxu1 %v4518_v62  ;;  %3613 = vmatprep.mubr.msk.f32.mxu1 %vm2068_vm9, %v5976_v42  ;;  %v4526_v42 = vpack.c.bf16 %v3575_v7, %v3573_v5  ;;  %v4528_v9 = vpack.c.bf16 %v3580_v1, %v3578_v8  ;;  %v4554_v62 = vpack.c.bf16 %v3603_v59, %v3601_v58  ;;  %v3609_v5 = vld [vmem:[%s7053_s5 + $0x460] sm:$0xff]  ;;  %v3611_v7 = vld [vmem:[%s7053_s5 + $0x470] sm:$0xff]  ;;  %v3615_v8 = vld [vmem:[%s7053_s5 + $0x488] sm:$0xff] }
 0x347   : > { %4521 = vmatprep.subr.bf16.mxu1 %v4520_v63  ;;  %v4556_v63 = vpack.c.bf16 %v3608_v61, %v3606_v60  ;;  %v3617_v1 = vld [vmem:[%s7053_s5 + $0x498] sm:$0xff]  ;;  %v3643_v58 = vld [vmem:[%s7053_s5 + $0x568] sm:$0xff] }
 0x348   : > { %v3645_v59 = vld [vmem:[%s7053_s5 + $0x578] sm:$0xff] }
 0x349   : > { %v4592_v61 = vpack.c.bf16 %v3645_v59, %v3643_v58  ;;  %v3679_v58 = vld [vmem:[%s7053_s5 + $0x680] sm:$0xff]  ;;  %v3681_v59 = vld [vmem:[%s7053_s5 + $0x690] sm:$0xff] }
 0x34a   : > { %4523 = vmatpush1.bf16.msra.mxu1 %v4522_v0  ;;  %v4558_v0 = vpack.c.bf16 %v3607_v12, %v3605_v30  ;;  %v3647_v30 = vld [vmem:[%s7053_s5 + $0x588] sm:$0xff]  ;;  %v3649_v12 = vld [vmem:[%s7053_s5 + $0x598] sm:$0xff] }
 0x34b   : > { %4525 = vmatprep.subr.bf16.mxu1 %v4524_v2  ;;  %v4560_v2 = vpack.c.bf16 %v3612_v32, %v3610_v31  ;;  %v4596_v32 = vpack.c.bf16 %v3649_v12, %v3647_v30  ;;  %v3683_v30 = vld [vmem:[%s7053_s5 + $0x6a0] sm:$0xff]  ;;  %v3685_v12 = vld [vmem:[%s7053_s5 + $0x6b0] sm:$0xff] }
 0x34e   : > { %4527 = vmatpush1.bf16.msra.mxu1 %v4526_v42  ;;  %v4562_v42 = vpack.c.bf16 %v3611_v7, %v3609_v5  ;;  %v3651_v5 = vld [vmem:[%s7053_s5 + $0x5a8] sm:$0xff]  ;;  %v3653_v7 = vld [vmem:[%s7053_s5 + $0x5b8] sm:$0xff] }
 0x34f   : > { %4529 = vmatprep.subr.bf16.mxu1 %v4528_v9  ;;  %v4564_v9 = vpack.c.bf16 %v3617_v1, %v3615_v8  ;;  %v4600_v1 = vpack.c.bf16 %v3653_v7, %v3651_v5  ;;  %v3687_v5 = vld [vmem:[%s7053_s5 + $0x6c0] sm:$0xff]  ;;  %v3689_v7 = vld [vmem:[%s7053_s5 + $0x6d0] sm:$0xff] }
 0x352   : > { %4531 = vmatpush1.bf16.msra.mxu1 %v4530_v16  ;;  %v4566_v16 = vpack.c.bf16 %v3616_v11, %v3614_v10  ;;  %v3655_v10 = vld [vmem:[%s7053_s5 + $0x5c8] sm:$0xff]  ;;  %v3657_v11 = vld [vmem:[%s7053_s5 + $0x5d8] sm:$0xff] }
 0x353   : > { %4533 = vmatprep.subr.bf16.mxu1 %v4532_v17  ;;  %v4568_v17 = vpack.c.bf16 %v3621_v15, %v3619_v14  ;;  %v4604_v15 = vpack.c.bf16 %v3657_v11, %v3655_v10  ;;  %v3691_v10 = vld [vmem:[%s7053_s5 + $0x6e0] sm:$0xff]  ;;  %v3693_v11 = vld [vmem:[%s7053_s5 + $0x6f0] sm:$0xff] }
 0x356   : > { %4535 = vmatpush1.bf16.msra.mxu1 %v4534_v22  ;;  %v4570_v22 = vpack.c.bf16 %v3620_v19, %v3618_v18  ;;  %v3659_v18 = vld [vmem:[%s7053_s5 + $0x5e8] sm:$0xff]  ;;  %v3661_v19 = vld [vmem:[%s7053_s5 + $0x5f8] sm:$0xff] }
 0x357   : > { %4537 = vmatprep.subr.bf16.mxu1 %v4536_v23  ;;  %v4572_v23 = vpack.c.bf16 %v3625_v21, %v3623_v20  ;;  %v4608_v21 = vpack.c.bf16 %v3661_v19, %v3659_v18  ;;  %v3695_v18 = vld [vmem:[%s7053_s5 + $0x700] sm:$0xff]  ;;  %v3697_v19 = vld [vmem:[%s7053_s5 + $0x710] sm:$0xff] }
 0x35a   : > { %4539 = vmatpush1.bf16.msra.mxu1 %v4538_v28  ;;  %v3626_v28 = vld [vmem:[%s7053_s5 + $0x4e0] sm:$0xff] }
 0x35b   : > { %4541 = vmatprep.subr.bf16.mxu1 %v4540_v29  ;;  %v3628_v29 = vld [vmem:[%s7053_s5 + $0x4f0] sm:$0xff] }
 0x35c   : > { %v4578_v37 = vpack.c.bf16 %v3628_v29, %v3626_v28  ;;  %v3668_v28 = vld [vmem:[%s7053_s5 + $0x628] sm:$0xff]  ;;  %v3670_v29 = vld [vmem:[%s7053_s5 + $0x638] sm:$0xff] }
 0x35d   : > { %v4616_v36 = vpack.c.bf16 %v3670_v29, %v3668_v28  ;;  %v3703_v28 = vld [vmem:[%s7053_s5 + $0x740] sm:$0xff]  ;;  %v3705_v29 = vld [vmem:[%s7053_s5 + $0x750] sm:$0xff] }
 0x35e   : > { %4543 = vmatpush1.bf16.msra.mxu1 %v4542_v40  ;;  %v3630_v40 = vld [vmem:[%s7053_s5 + $0x500] sm:$0xff] }
 0x35f   : > { %4545 = vmatprep.subr.bf16.mxu1 %v4544_v41  ;;  %v3632_v41 = vld [vmem:[%s7053_s5 + $0x510] sm:$0xff] }
 0x360   : > { %v4582_v48 = vpack.c.bf16 %v3632_v41, %v3630_v40  ;;  %v3672_v40 = vld [vmem:[%s7053_s5 + $0x648] sm:$0xff]  ;;  %v3674_v41 = vld [vmem:[%s7053_s5 + $0x658] sm:$0xff] }
 0x361   : > { %v4620_v45 = vpack.c.bf16 %v3674_v41, %v3672_v40  ;;  %v3707_v40 = vld [vmem:[%s7053_s5 + $0x760] sm:$0xff]  ;;  %v3709_v41 = vld [vmem:[%s7053_s5 + $0x770] sm:$0xff] }
 0x362   : > { %4547 = vmatpush1.bf16.msra.mxu1 %v4546_v50  ;;  %v3634_v50 = vld [vmem:[%s7053_s5 + $0x520] sm:$0xff] }
 0x363   : > { %4549 = vmatprep.subr.bf16.mxu1 %v4548_v51  ;;  %v3636_v51 = vld [vmem:[%s7053_s5 + $0x530] sm:$0xff] }
 0x364   : > { %v4586_v54 = vpack.c.bf16 %v3636_v51, %v3634_v50  ;;  %v3676_v50 = vld [vmem:[%s7053_s5 + $0x668] sm:$0xff] }
 0x366   : > { %4551 = vmatpush1.bf16.msra.mxu1 %v4550_v56  ;;  %v3638_v56 = vld [vmem:[%s7053_s5 + $0x540] sm:$0xff] }
 0x367   : > { %4553 = vmatprep.subr.bf16.mxu1 %v4552_v57  ;;  %v3640_v57 = vld [vmem:[%s7053_s5 + $0x550] sm:$0xff] }
 0x368   : > { %v4590_v60 = vpack.c.bf16 %v3640_v57, %v3638_v56  ;;  %v4626_v56 = vpack.c.bf16 %v3677_v53, %v3675_v52  ;;  %v2717_v52 = vld [vmem:[%s7056_s8 + $0x88] sm:$0xff]  ;;  %v2719_v53 = vld [vmem:[%s7056_s8 + $0x98] sm:$0xff] }
 0x36a   : > { %4555 = vmatpush1.bf16.msra.mxu1 %v4554_v62  ;;  %v3642_v62 = vld [vmem:[%s7053_s5 + $0x560] sm:$0xff] }
 0x36b   : > { %4557 = vmatprep.subr.bf16.mxu1 %v4556_v63  ;;  %v3644_v63 = vld [vmem:[%s7053_s5 + $0x570] sm:$0xff] }
 0x36c   : > { %v4594_v31 = vpack.c.bf16 %v3644_v63, %v3642_v62  ;;  %v4630_v62 = vpack.c.bf16 %v3681_v59, %v3679_v58 }
 0x36e   : > { %4559 = vmatpush1.bf16.msra.mxu1 %v4558_v0  ;;  %v3646_v0 = vld [vmem:[%s7053_s5 + $0x580] sm:$0xff] }
 0x36f   : > { %4561 = vmatprep.subr.bf16.mxu1 %v4560_v2  ;;  %v3648_v2 = vld [vmem:[%s7053_s5 + $0x590] sm:$0xff] }
 0x370   : > { %v4598_v8 = vpack.c.bf16 %v3648_v2, %v3646_v0  ;;  %v4634_v0 = vpack.c.bf16 %v3685_v12, %v3683_v30 }
 0x372   : > { %4563 = vmatpush1.bf16.msra.mxu1 %v4562_v42  ;;  %v3650_v42 = vld [vmem:[%s7053_s5 + $0x5a0] sm:$0xff] }
 0x373   : > { %4565 = vmatprep.subr.bf16.mxu1 %v4564_v9  ;;  %v3652_v9 = vld [vmem:[%s7053_s5 + $0x5b0] sm:$0xff] }
 0x374   : > { %v4602_v14 = vpack.c.bf16 %v3652_v9, %v3650_v42  ;;  %v4638_v42 = vpack.c.bf16 %v3689_v7, %v3687_v5 }
 0x375   : > { %2338 = vmatmul.mubr.f32.vlgmr.msra.gmra.mrb[36].mxu1 %v5962_v34  ;;  %v3629_v34 = vld [vmem:[%s7053_s5 + $0x4f8] sm:$0xff] }
 0x376   : > { %4567 = vmatpush1.bf16.msra.mxu1 %v4566_v16  ;;  %3662 = vmatprep.mubr.msk.f32.mxu1 %vm2068_vm9, %v5979_v43  ;;  %v4574_v43 = vpack.c.bf16 %v3624_v25, %v3622_v24  ;;  %v4576_v27 = vpack.c.bf16 %v3629_v34, %v3627_v26  ;;  %v3654_v16 = vld [vmem:[%s7053_s5 + $0x5c0] sm:$0xff]  ;;  %v3664_v24 = vld [vmem:[%s7053_s5 + $0x608] sm:$0xff]  ;;  %v3666_v25 = vld [vmem:[%s7053_s5 + $0x618] sm:$0xff] }
 0x377   : > { %4569 = vmatprep.subr.bf16.mxu1 %v4568_v17  ;;  %v3656_v17 = vld [vmem:[%s7053_s5 + $0x5d0] sm:$0xff]  ;;  %v4612_v34 = vpack.c.bf16 %v3666_v25, %v3664_v24  ;;  %v3699_v24 = vld [vmem:[%s7053_s5 + $0x720] sm:$0xff] }
 0x378   : > { %v4606_v20 = vpack.c.bf16 %v3656_v17, %v3654_v16  ;;  %v4642_v16 = vpack.c.bf16 %v3693_v11, %v3691_v10  ;;  %v3701_v25 = vld [vmem:[%s7053_s5 + $0x730] sm:$0xff] }
 0x37a   : > { %4571 = vmatpush1.bf16.msra.mxu1 %v4570_v22  ;;  %v3658_v22 = vld [vmem:[%s7053_s5 + $0x5e0] sm:$0xff] }
 0x37b   : > { %4573 = vmatprep.subr.bf16.mxu1 %v4572_v23  ;;  %v3660_v23 = vld [vmem:[%s7053_s5 + $0x5f0] sm:$0xff] }
 0x37c   : > { %v4610_v26 = vpack.c.bf16 %v3660_v23, %v3658_v22  ;;  %v4646_v22 = vpack.c.bf16 %v3697_v19, %v3695_v18 }
 0x37e   : > { %4575 = vmatpush1.bf16.msra.mxu1 %v4574_v43  ;;  %v3663_v43 = vld [vmem:[%s7053_s5 + $0x600] sm:$0xff] }
 0x37f   : > { %4577 = vmatprep.subr.bf16.mxu1 %v4576_v27  ;;  %v3665_v27 = vld [vmem:[%s7053_s5 + $0x610] sm:$0xff] }
 0x380   : > { %v4614_v33 = vpack.c.bf16 %v3665_v27, %v3663_v43  ;;  %v4650_v43 = vpack.c.bf16 %v3701_v25, %v3699_v24 }
 0x382   : > { %4579 = vmatpush1.bf16.msra.mxu1 %v4578_v37  ;;  %v3667_v37 = vld [vmem:[%s7053_s5 + $0x620] sm:$0xff] }
 0x383   : > { %4581 = vmatprep.subr.bf16.mxu1 %v4580_v39  ;;  %v3669_v39 = vld [vmem:[%s7053_s5 + $0x630] sm:$0xff] }
 0x384   : > { %v4618_v44 = vpack.c.bf16 %v3669_v39, %v3667_v37  ;;  %v4654_v37 = vpack.c.bf16 %v3705_v29, %v3703_v28 }
 0x386   : > { %4583 = vmatpush1.bf16.msra.mxu1 %v4582_v48  ;;  %v3671_v48 = vld [vmem:[%s7053_s5 + $0x640] sm:$0xff] }
 0x387   : > { %4585 = vmatprep.subr.bf16.mxu1 %v4584_v49  ;;  %v3673_v49 = vld [vmem:[%s7053_s5 + $0x650] sm:$0xff] }
 0x38a   : > { %4587 = vmatpush1.bf16.msra.mxu1 %v4586_v54  ;;  %v3680_v54 = vld [vmem:[%s7053_s5 + $0x688] sm:$0xff] }
 0x38b   : > { %4589 = vmatprep.subr.bf16.mxu1 %v4588_v55  ;;  %v3682_v55 = vld [vmem:[%s7053_s5 + $0x698] sm:$0xff] }
 0x38c   : > { %v4628_v57 = vpack.c.bf16 %v3682_v55, %v3680_v54 }
 0x38e   : > { %4591 = vmatpush1.bf16.msra.mxu1 %v4590_v60  ;;  %v3684_v60 = vld [vmem:[%s7053_s5 + $0x6a8] sm:$0xff] }
 0x38f   : > { %4593 = vmatprep.subr.bf16.mxu1 %v4592_v61  ;;  %v3686_v61 = vld [vmem:[%s7053_s5 + $0x6b8] sm:$0xff] }
 0x390   : > { %v4632_v63 = vpack.c.bf16 %v3686_v61, %v3684_v60  ;;  %v2702_v60 = vld [vmem:[%s7056_s8 + $0x10] sm:$0xff]  ;;  %v2703_v61 = vld [vmem:[%s7056_s8 + $0x18] sm:$0xff] }
 0x391   : > { %v4666_v30 = vpack.c.bf16 %v2703_v61, %v2702_v60  ;;  %v2817_v60 = vld [vmem:[%s7057_s9 + $0x70] sm:$0xff]  ;;  %v2818_v61 = vld [vmem:[%s7057_s9 + $0x78] sm:$0xff] }
 0x392   : > { %4595 = vmatpush1.bf16.msra.mxu1 %v4594_v31  ;;  %v3688_v31 = vld [vmem:[%s7053_s5 + $0x6c8] sm:$0xff] }
 0x393   : > { %4597 = vmatprep.subr.bf16.mxu1 %v4596_v32  ;;  %v3690_v32 = vld [vmem:[%s7053_s5 + $0x6d8] sm:$0xff] }
 0x394   : > { %v4636_v2 = vpack.c.bf16 %v3690_v32, %v3688_v31  ;;  %v2704_v31 = vld [vmem:[%s7056_s8 + $0x20] sm:$0xff]  ;;  %v2705_v32 = vld [vmem:[%s7056_s8 + $0x28] sm:$0xff] }
 0x395   : > { %v4670_v5 = vpack.c.bf16 %v2705_v32, %v2704_v31  ;;  %v3165_v32 = vld [vmem:[%s7059_s11 + $0x18] sm:$0xff] }
 0x396   : > { %4599 = vmatpush1.bf16.msra.mxu1 %v4598_v8  ;;  %v3692_v8 = vld [vmem:[%s7053_s5 + $0x6e8] sm:$0xff] }
 0x397   : > { %4601 = vmatprep.subr.bf16.mxu1 %v4600_v1  ;;  %v3694_v1 = vld [vmem:[%s7053_s5 + $0x6f8] sm:$0xff] }
 0x398   : > { %v4640_v9 = vpack.c.bf16 %v3694_v1, %v3692_v8  ;;  %v2706_v8 = vld [vmem:[%s7056_s8 + $0x30] sm:$0xff]  ;;  %v2707_v1 = vld [vmem:[%s7056_s8 + $0x38] sm:$0xff] }
 0x399   : > { %v4674_v10 = vpack.c.bf16 %v2707_v1, %v2706_v8  ;;  %v3168_v8 = vld [vmem:[%s7059_s11 + $0x30] sm:$0xff]  ;;  %v3169_v1 = vld [vmem:[%s7059_s11 + $0x38] sm:$0xff] }
 0x39a   : > { %4603 = vmatpush1.bf16.msra.mxu1 %v4602_v14  ;;  %v3696_v14 = vld [vmem:[%s7053_s5 + $0x708] sm:$0xff] }
 0x39b   : > { %4605 = vmatprep.subr.bf16.mxu1 %v4604_v15  ;;  %v3698_v15 = vld [vmem:[%s7053_s5 + $0x718] sm:$0xff] }
 0x39c   : > { %v4644_v17 = vpack.c.bf16 %v3698_v15, %v3696_v14  ;;  %v2708_v14 = vld [vmem:[%s7056_s8 + $0x40] sm:$0xff]  ;;  %v2709_v15 = vld [vmem:[%s7056_s8 + $0x48] sm:$0xff] }
 0x39d   : > { %v4678_v18 = vpack.c.bf16 %v2709_v15, %v2708_v14 }
 0x39e   : > { %4607 = vmatpush1.bf16.msra.mxu1 %v4606_v20  ;;  %v3700_v20 = vld [vmem:[%s7053_s5 + $0x728] sm:$0xff] }
 0x39f   : > { %4609 = vmatprep.subr.bf16.mxu1 %v4608_v21  ;;  %v3702_v21 = vld [vmem:[%s7053_s5 + $0x738] sm:$0xff] }
 0x3a0   : > { %v4648_v23 = vpack.c.bf16 %v3702_v21, %v3700_v20  ;;  %v2710_v20 = vld [vmem:[%s7056_s8 + $0x50] sm:$0xff]  ;;  %v2711_v21 = vld [vmem:[%s7056_s8 + $0x58] sm:$0xff] }
 0x3a1   : > { %v4682_v24 = vpack.c.bf16 %v2711_v21, %v2710_v20  ;;  %v3717_v20 = vld [vmem:[%s7057_s9 + $0xa0] sm:$0xff]  ;;  %v3718_v21 = vld [vmem:[%s7057_s9 + $0xa8] sm:$0xff] }
 0x3a2   : > { %4611 = vmatpush1.bf16.msra.mxu1 %v4610_v26  ;;  %v3704_v26 = vld [vmem:[%s7053_s5 + $0x748] sm:$0xff] }
 0x3a3   : > { %4613 = vmatprep.subr.bf16.mxu1 %v4612_v34  ;;  %v3706_v34 = vld [vmem:[%s7053_s5 + $0x758] sm:$0xff] }
 0x3a4   : > { %v4652_v27 = vpack.c.bf16 %v3706_v34, %v3704_v26  ;;  %v2712_v26 = vld [vmem:[%s7056_s8 + $0x60] sm:$0xff]  ;;  %v2713_v34 = vld [vmem:[%s7056_s8 + $0x68] sm:$0xff] }
 0x3a5   : > { %2469 = vmatmul.mubr.f32.vlgmr.msra.gmra.mrb[36].mxu1 %v5965_v35  ;;  %v3678_v35 = vld [vmem:[%s7053_s5 + $0x678] sm:$0xff]  ;;  %v4686_v28 = vpack.c.bf16 %v2713_v34, %v2712_v26  ;;  %v3721_v26 = vld [vmem:[%s7057_s9 + $0xc0] sm:$0xff]  ;;  %v3722_v34 = vld [vmem:[%s7057_s9 + $0xc8] sm:$0xff] }
 0x3a6   : > { %4615 = vmatpush1.bf16.msra.mxu1 %v4614_v33  ;;  %3711 = vmatprep.mubr.msk.f32.mxu1 %vm2068_vm9, %v5989_v46  ;;  %v4622_v46 = vpack.c.bf16 %v3673_v49, %v3671_v48  ;;  %v4624_v51 = vpack.c.bf16 %v3678_v35, %v3676_v50  ;;  %v3708_v33 = vld [vmem:[%s7053_s5 + $0x768] sm:$0xff] }
 0x3a7   : > { %4617 = vmatprep.subr.bf16.mxu1 %v4616_v36  ;;  %v3710_v36 = vld [vmem:[%s7053_s5 + $0x778] sm:$0xff] }
 0x3a8   : > { %v4656_v39 = vpack.c.bf16 %v3710_v36, %v3708_v33  ;;  %v2714_v33 = vld [vmem:[%s7056_s8 + $0x70] sm:$0xff]  ;;  %v2715_v36 = vld [vmem:[%s7056_s8 + $0x78] sm:$0xff] }
 0x3aa   : > { %4619 = vmatpush1.bf16.msra.mxu1 %v4618_v44  ;;  %v4658_v44 = vpack.c.bf16 %v3709_v41, %v3707_v40  ;;  %v2804_v40 = vld [vmem:[%s7057_s9 + $0x8] sm:$0xff] }
 0x3ab   : > { %4621 = vmatprep.subr.bf16.mxu1 %v4620_v45  ;;  %v2608_v45 = vld [vmem:[%s7054_s6] sm:$0x3] }
 0x3ac   : > { %v2613_v48 = vrot.slane %v2608_v45, %v1518_v4  ;;  %v2617_v49 = vrot.slane %v2608_v45, %v1522_v6  ;;  %v2700_v4 = vld [vmem:[%s7056_s8] sm:$0xff]  ;;  %v2718_v6 = vld [vmem:[%s7056_s8 + $0x90] sm:$0xff] }
 0x3ad   : > { %v4664_v59 = vpack.c.bf16 %v2719_v53, %v2718_v6  ;;  %v2812_v6 = vld [vmem:[%s7057_s9 + $0x48] sm:$0xff] }
 0x3ae   : > { %4623 = vmatpush1.bf16.msra.mxu1 %v4622_v46 }
 0x3af   : > { %4625 = vmatprep.subr.bf16.mxu1 %v4624_v51 }
 0x3b2   : > { %4627 = vmatpush1.bf16.msra.mxu1 %v4626_v56  ;;  %v2624_v56 = vld [vmem:[%s7055_s7] sm:$0xf] }
 0x3b3   : > { %4629 = vmatprep.subr.bf16.mxu1 %v4628_v57  ;;  %v4662_v57 = vpack.c.bf16 %v2701_v38, %v2700_v4  ;;  %v2811_v38 = vld [vmem:[%s7057_s9 + $0x40] sm:$0xff] }
 0x3b4   : > { %v4705_v53 = vpack.c.bf16 %v2812_v6, %v2811_v38  ;;  %v3736_v38 = vld [vmem:[%s7057_s9 + $0x138] sm:$0xff] }
 0x3b6   : > { %4631 = vmatpush1.bf16.msra.mxu1 %v4630_v62  ;;  %v2720_v62 = vld [vmem:[%s7056_s8 + $0xa0] sm:$0xff] }
 0x3b7   : > { %4633 = vmatprep.subr.bf16.mxu1 %v4632_v63  ;;  %v2721_v63 = vld [vmem:[%s7056_s8 + $0xa8] sm:$0xff] }
 0x3b8   : > { %v4668_v12 = vpack.c.bf16 %v2721_v63, %v2720_v62  ;;  %v4714_v62 = vpack.c.bf16 %v2818_v61, %v2817_v60  ;;  %v3162_v63 = vld [vmem:[%s7059_s11] sm:$0xff]  ;;  %v3742_v60 = vld [vmem:[%s7057_s9 + $0x168] sm:$0xff] }
 0x3ba   : > { %4635 = vmatpush1.bf16.msra.mxu1 %v4634_v0  ;;  %v2722_v0 = vld [vmem:[%s7056_s8 + $0xb0] sm:$0xff] }
 0x3bb   : > { %4637 = vmatprep.subr.bf16.mxu1 %v4636_v2  ;;  %v2723_v2 = vld [vmem:[%s7056_s8 + $0xb8] sm:$0xff] }
 0x3bc   : > { %v4672_v7 = vpack.c.bf16 %v2723_v2, %v2722_v0  ;;  %v3166_v2 = vld [vmem:[%s7059_s11 + $0x20] sm:$0xff] }
 0x3be   : > { %4639 = vmatpush1.bf16.msra.mxu1 %v4638_v42  ;;  %v2724_v42 = vld [vmem:[%s7056_s8 + $0xc0] sm:$0xff] }
 0x3bf   : > { %4641 = vmatprep.subr.bf16.mxu1 %v4640_v9  ;;  %v2725_v9 = vld [vmem:[%s7056_s8 + $0xc8] sm:$0xff] }
 0x3c0   : > { %v4676_v11 = vpack.c.bf16 %v2725_v9, %v2724_v42  ;;  %v4798_v42 = vpack.c.bf16 %v3169_v1, %v3168_v8  ;;  %v3713_v9 = vld [vmem:[%s7057_s9 + $0x80] sm:$0xff]  ;;  %v3750_v1 = vld [vmem:[%s7057_s9 + $0x1a8] sm:$0xff] }
 0x3c1   : > { %v3749_v8 = vld [vmem:[%s7057_s9 + $0x1a0] sm:$0xff] }
 0x3c2   : > { %4643 = vmatpush1.bf16.msra.mxu1 %v4642_v16  ;;  %v2726_v16 = vld [vmem:[%s7056_s8 + $0xd0] sm:$0xff] }
 0x3c3   : > { %4645 = vmatprep.subr.bf16.mxu1 %v4644_v17  ;;  %v2727_v17 = vld [vmem:[%s7056_s8 + $0xd8] sm:$0xff] }
 0x3c4   : > { %v4680_v19 = vpack.c.bf16 %v2727_v17, %v2726_v16  ;;  %v3715_v17 = vld [vmem:[%s7057_s9 + $0x90] sm:$0xff] }
 0x3c6   : > { %4647 = vmatpush1.bf16.msra.mxu1 %v4646_v22  ;;  %v2728_v22 = vld [vmem:[%s7056_s8 + $0xe0] sm:$0xff] }
 0x3c7   : > { %4649 = vmatprep.subr.bf16.mxu1 %v4648_v23  ;;  %v2729_v23 = vld [vmem:[%s7056_s8 + $0xe8] sm:$0xff] }
 0x3c8   : > { %v4684_v25 = vpack.c.bf16 %v2729_v23, %v2728_v22  ;;  %v4723_v22 = vpack.c.bf16 %v3718_v21, %v3717_v20  ;;  %v3719_v23 = vld [vmem:[%s7057_s9 + $0xb0] sm:$0xff]  ;;  %v3757_v21 = vld [vmem:[%s7057_s9 + $0x1e0] sm:$0xff] }
 0x3ca   : > { %4651 = vmatpush1.bf16.msra.mxu1 %v4650_v43  ;;  %v2730_v43 = vld [vmem:[%s7056_s8 + $0xf0] sm:$0xff] }
 0x3cb   : > { %4653 = vmatprep.subr.bf16.mxu1 %v4652_v27  ;;  %v2731_v27 = vld [vmem:[%s7056_s8 + $0xf8] sm:$0xff] }
 0x3cc   : > { %v4688_v29 = vpack.c.bf16 %v2731_v27, %v2730_v43  ;;  %v4729_v43 = vpack.c.bf16 %v3722_v34, %v3721_v26  ;;  %v3723_v27 = vld [vmem:[%s7057_s9 + $0xd0] sm:$0xff] }
 0x3ce   : > { %4655 = vmatpush1.bf16.msra.mxu1 %v4654_v37  ;;  %v4690_v37 = vpack.c.bf16 %v2715_v36, %v2714_v33  ;;  %v3725_v33 = vld [vmem:[%s7057_s9 + $0xe0] sm:$0xff]  ;;  %v3726_v36 = vld [vmem:[%s7057_s9 + $0xe8] sm:$0xff] }
 0x3cf   : > { %4657 = vmatprep.subr.bf16.mxu1 %v4656_v39  ;;  %v2803_v39 = vld [vmem:[%s7057_s9] sm:$0xff] }
 0x3d2   : > { %4659 = vmatpush1.bf16.msra.mxu1 %v4658_v44  ;;  %v4693_v44 = vpack.c.bf16 %v2804_v40, %v2803_v39  ;;  %v3727_v39 = vld [vmem:[%s7057_s9 + $0xf0] sm:$0xff]  ;;  %v3728_v40 = vld [vmem:[%s7057_s9 + $0xf8] sm:$0xff] }
 0x3d3   : > { %4788 = vmatprep.subr.bf16.mxu1 %v5000_v3 }
 0x3d5   : > { %2600 = vmatmul.mubr.f32.vlgmr.msra.gmra.mrb[36].mxu1 %v5992_v47  ;;  %v2716_v47 = vld [vmem:[%s7056_s8 + $0x80] sm:$0xff] }
 0x3d6   : > { %4203 = vmatprep.mubr.msk.f32.mxu1 %vm5002_vm3, %v5003_v13  ;;  %v4660_v54 = vpack.c.bf16 %v2717_v52, %v2716_v47  ;;  %v2809_v47 = vld [vmem:[%s7057_s9 + $0x30] sm:$0xff]  ;;  %v2810_v52 = vld [vmem:[%s7057_s9 + $0x38] sm:$0xff] }
 0x3d7   : > { %v4702_v4 = vpack.c.bf16 %v2810_v52, %v2809_v47  ;;  %v3734_v47 = vld [vmem:[%s7057_s9 + $0x128] sm:$0xff] }
 0x4a8   : > { %v2601_v50 = vpop.f32.mrb[36].mxu1 }
 0x4a9   : > { %v2620_v35 = vadd.f32 %v2613_v48, %v2601_v50  ;;  %v2603_v46 = vpop.f32.mrb[37].mxu1  ;;  %v2805_v48 = vld [vmem:[%s7057_s9 + $0x10] sm:$0xff] }
 0x4aa   : > { %v2621_v51 = vadd.f32 %v2617_v49, %v2603_v46  ;;  %v2806_v49 = vld [vmem:[%s7057_s9 + $0x18] sm:$0xff]  ;;  %v2808_v46 = vld [vmem:[%s7057_s9 + $0x28] sm:$0xff] }
 0x4ab   : > { %v4696_v50 = vpack.c.bf16 %v2806_v49, %v2805_v48 }
 0x4ac   : > { %4928 = vtanh.f32 %v2621_v51 }
 0x4ad   : > { %4930 = vtanh.f32 %v2620_v35  ;;  %v2807_v35 = vld [vmem:[%s7057_s9 + $0x20] sm:$0xff] }
 0x4ae   : > { %v4699_v51 = vpack.c.bf16 %v2808_v46, %v2807_v35  ;;  %v3732_v35 = vld [vmem:[%s7057_s9 + $0x118] sm:$0xff] }
 0x4b6   : > { %v4929_v55 = vpop.eup %4928 }
 0x4b7   : > { %v4931_v58 = vpop.eup %4930  ;;  %2629 = vmatprep.subr.mxu0 %v4929_v55  ;;  %v2814_v55 = vld [vmem:[%s7057_s9 + $0x58] sm:$0xff] }
 0x4b8   : > { %2630 = vmatpush1.msra.mxu0 %v4931_v58  ;;  %v2816_v58 = vld [vmem:[%s7057_s9 + $0x68] sm:$0xff] }
 0x4b9   : > { %3712 = vmatmul.mubr.msk.f32.vlgmr.msra.gmra.mrb[10].mxu0 %vm2625_vm10, %v2624_v56  ;;  %4661 = vmatprep.subr.bf16.mxu0 %v4660_v54  ;;  %v2813_v54 = vld [vmem:[%s7057_s9 + $0x50] sm:$0xff] }
 0x4ba   : > { %4663 = vmatpush3.bf16.msra.mxu0 %v4662_v57  ;;  %v4708_v56 = vpack.c.bf16 %v2814_v55, %v2813_v54  ;;  %v2815_v57 = vld [vmem:[%s7057_s9 + $0x60] sm:$0xff]  ;;  %v3738_v54 = vld [vmem:[%s7057_s9 + $0x148] sm:$0xff] }
 0x4bb   : > { %4665 = vmatprep.subr.bf16.mxu0 %v4664_v59  ;;  %v4711_v59 = vpack.c.bf16 %v2816_v58, %v2815_v57  ;;  %v3740_v57 = vld [vmem:[%s7057_s9 + $0x158] sm:$0xff] }
 0x4be   : > { %4667 = vmatpush3.bf16.msra.mxu0 %v4666_v30  ;;  %v3163_v30 = vld [vmem:[%s7059_s11 + $0x8] sm:$0xff] }
 0x4bf   : > { %4669 = vmatprep.subr.bf16.mxu0 %v4668_v12  ;;  %v3164_v12 = vld [vmem:[%s7059_s11 + $0x10] sm:$0xff]  ;;  %v4789_v31 = vpack.c.bf16 %v3163_v30, %v3162_v63  ;;  %v3744_v63 = vld [vmem:[%s7057_s9 + $0x178] sm:$0xff] }
 0x4c0   : > { %v4792_v0 = vpack.c.bf16 %v3165_v32, %v3164_v12  ;;  %v3745_v12 = vld [vmem:[%s7057_s9 + $0x180] sm:$0xff] }
 0x4c1   : > { %4790 = vmatpush3.bf16.msra.mxu1 %v4789_v31  ;;  %v3746_v31 = vld [vmem:[%s7057_s9 + $0x188] sm:$0xff] }
 0x4c2   : > { %4671 = vmatpush3.bf16.msra.mxu0 %v4670_v5  ;;  %4791 = vmatprep.subr.bf16.mxu1 %v5000_v3  ;;  %v3167_v5 = vld [vmem:[%s7059_s11 + $0x28] sm:$0xff]  ;;  %v4765_v32 = vpack.c.bf16 %v3746_v31, %v3745_v12 }
 0x4c3   : > { %4673 = vmatprep.subr.bf16.mxu0 %v4672_v7  ;;  %v4795_v7 = vpack.c.bf16 %v3167_v5, %v3166_v2  ;;  %v3747_v2 = vld [vmem:[%s7057_s9 + $0x190] sm:$0xff]  ;;  %v3748_v5 = vld [vmem:[%s7057_s9 + $0x198] sm:$0xff] }
 0x4c5   : > { %4793 = vmatpush3.bf16.msra.mxu1 %v4792_v0 }
 0x4c6   : > { %4675 = vmatpush3.bf16.msra.mxu0 %v4674_v10  ;;  %4794 = vmatprep.subr.bf16.mxu1 %v5000_v3  ;;  %v3714_v10 = vld [vmem:[%s7057_s9 + $0x88] sm:$0xff] }
 0x4c7   : > { %4677 = vmatprep.subr.bf16.mxu0 %v4676_v11  ;;  %v4717_v15 = vpack.c.bf16 %v3714_v10, %v3713_v9  ;;  %v3751_v9 = vld [vmem:[%s7057_s9 + $0x1b0] sm:$0xff]  ;;  %v3752_v10 = vld [vmem:[%s7057_s9 + $0x1b8] sm:$0xff] }
 0x4c9   : > { %4796 = vmatpush3.bf16.msra.mxu1 %v4795_v7  ;;  %v4768_v7 = vpack.c.bf16 %v3748_v5, %v3747_v2 }
 0x4ca   : > { %4679 = vmatpush3.bf16.msra.mxu0 %v4678_v18  ;;  %4797 = vmatprep.subr.bf16.mxu1 %v5000_v3  ;;  %v3716_v18 = vld [vmem:[%s7057_s9 + $0x98] sm:$0xff] }
 0x4cb   : > { %4681 = vmatprep.subr.bf16.mxu0 %v4680_v19  ;;  %v4720_v19 = vpack.c.bf16 %v3716_v18, %v3715_v17  ;;  %v3755_v18 = vld [vmem:[%s7057_s9 + $0x1d0] sm:$0xff] }
 0x4cd   : > { %4799 = vmatpush3.bf16.msra.mxu1 %v4798_v42  ;;  %v4771_v42 = vpack.c.bf16 %v3750_v1, %v3749_v8 }
 0x4ce   : > { %4683 = vmatpush3.bf16.msra.mxu0 %v4682_v24  ;;  %4800 = vmatprep.subr.bf16.mxu1 %v5000_v3  ;;  %v3720_v24 = vld [vmem:[%s7057_s9 + $0xb8] sm:$0xff] }
 0x4cf   : > { %4685 = vmatprep.subr.bf16.mxu0 %v4684_v25  ;;  %v4726_v25 = vpack.c.bf16 %v3720_v24, %v3719_v23  ;;  %v3759_v24 = vld [vmem:[%s7057_s9 + $0x1f0] sm:$0xff] }
 0x4d2   : > { %4687 = vmatpush3.bf16.msra.mxu0 %v4686_v28  ;;  %v3724_v28 = vld [vmem:[%s7057_s9 + $0xd8] sm:$0xff] }
 0x4d3   : > { %4689 = vmatprep.subr.bf16.mxu0 %v4688_v29  ;;  %v4732_v29 = vpack.c.bf16 %v3724_v28, %v3723_v27  ;;  %v3171_v27 = vld [vmem:[%s7059_s11 + $0x48] sm:$0xff] }
 0x4d6   : > { %4691 = vmatpush3.bf16.msra.mxu0 %v4690_v37  ;;  %v4735_v37 = vpack.c.bf16 %v3726_v36, %v3725_v33  ;;  %v3174_v36 = vld [vmem:[%s7059_s11 + $0x60] sm:$0xff] }
 0x4d7   : > { %4692 = vmatprep.subr.bf16.mxu0 %v5000_v3 }
 0x58c   : > { %v2695_v41 = vpop.f32.mrb[10].mxu0 }
 0x58d   : > { %v2697_v45 = vpop.f32.mrb[11].mxu0 }
 0x58e   : > { %2796 = vmatprep.mubr.f32.mxu0 %v2697_v45  ;;  %v3730_v45 = vld [vmem:[%s7057_s9 + $0x108] sm:$0xff] }
 0x58f   : > { %2797 = vmatmul.mubr.f32.vlgmr.msra.gmra.mrb[12].mxu0 %v2695_v41  ;;  %v4738_v41 = vpack.c.bf16 %v3728_v40, %v3727_v39  ;;  %v3176_v40 = vld [vmem:[%s7059_s11 + $0x70] sm:$0xff] }
 0x590   : > { %4694 = vmatpush3.bf16.msra.mxu0 %v4693_v44  ;;  %4065 = vmatprep.mubr.msk.f32.mxu0 %vm5002_vm3, %v5003_v13  ;;  %v3729_v44 = vld [vmem:[%s7057_s9 + $0x100] sm:$0xff] }
 0x591   : > { %4695 = vmatprep.subr.bf16.mxu0 %v5000_v3  ;;  %v4741_v48 = vpack.c.bf16 %v3730_v45, %v3729_v44  ;;  %v3254_v44 = vld [vmem:[%s7061_s13 + $0x8] sm:$0xff]  ;;  %v3255_v45 = vld [vmem:[%s7061_s13 + $0x10] sm:$0xff] }
 0x594   : > { %4697 = vmatpush3.bf16.msra.mxu0 %v4696_v50  ;;  %v3731_v50 = vld [vmem:[%s7057_s9 + $0x110] sm:$0xff] }
 0x595   : > { %4698 = vmatprep.subr.bf16.mxu0 %v5000_v3  ;;  %v4744_v46 = vpack.c.bf16 %v3732_v35, %v3731_v50  ;;  %v2802_v35 = vld [vmem:[%s7058_s10] sm:$0x1] }
 0x598   : > { %4700 = vmatpush3.bf16.msra.mxu0 %v4699_v51  ;;  %v3733_v51 = vld [vmem:[%s7057_s9 + $0x120] sm:$0xff] }
 0x599   : > { %4701 = vmatprep.subr.bf16.mxu0 %v5000_v3  ;;  %v4747_v52 = vpack.c.bf16 %v3734_v47, %v3733_v51 }
 0x59c   : > { %4703 = vmatpush3.bf16.msra.mxu0 %v4702_v4  ;;  %v3735_v4 = vld [vmem:[%s7057_s9 + $0x130] sm:$0xff] }
 0x59d   : > { %4704 = vmatprep.subr.bf16.mxu0 %v5000_v3  ;;  %v4750_v6 = vpack.c.bf16 %v3736_v38, %v3735_v4  ;;  %v3257_v4 = vld [vmem:[%s7061_s13 + $0x20] sm:$0xff]  ;;  %v3258_v38 = vld [vmem:[%s7061_s13 + $0x28] sm:$0xff] }
 0x5a0   : > { %4706 = vmatpush3.bf16.msra.mxu0 %v4705_v53  ;;  %v3737_v53 = vld [vmem:[%s7057_s9 + $0x140] sm:$0xff] }
 0x5a1   : > { %4707 = vmatprep.subr.bf16.mxu0 %v5000_v3  ;;  %v4753_v55 = vpack.c.bf16 %v3738_v54, %v3737_v53  ;;  %v3259_v53 = vld [vmem:[%s7061_s13 + $0x30] sm:$0xff]  ;;  %v3260_v54 = vld [vmem:[%s7061_s13 + $0x38] sm:$0xff] }
 0x5a4   : > { %4709 = vmatpush3.bf16.msra.mxu0 %v4708_v56  ;;  %v3739_v56 = vld [vmem:[%s7057_s9 + $0x150] sm:$0xff] }
 0x5a5   : > { %4710 = vmatprep.subr.bf16.mxu0 %v5000_v3  ;;  %v4756_v58 = vpack.c.bf16 %v3740_v57, %v3739_v56  ;;  %v3261_v56 = vld [vmem:[%s7061_s13 + $0x40] sm:$0xff]  ;;  %v3262_v57 = vld [vmem:[%s7061_s13 + $0x48] sm:$0xff] }
 0x5a8   : > { %4712 = vmatpush3.bf16.msra.mxu0 %v4711_v59  ;;  %v3741_v59 = vld [vmem:[%s7057_s9 + $0x160] sm:$0xff] }
 0x5a9   : > { %4713 = vmatprep.subr.bf16.mxu0 %v5000_v3  ;;  %v4759_v61 = vpack.c.bf16 %v3742_v60, %v3741_v59  ;;  %v3263_v59 = vld [vmem:[%s7061_s13 + $0x50] sm:$0xf]  ;;  %v3177_v60 = vld [vmem:[%s7060_s12] sm:$0x1] }
 0x5ac   : > { %4715 = vmatpush3.bf16.msra.mxu0 %v4714_v62  ;;  %v3743_v62 = vld [vmem:[%s7057_s9 + $0x170] sm:$0xff] }
 0x5ad   : > { %4716 = vmatprep.subr.bf16.mxu0 %v5000_v3  ;;  %v4762_v30 = vpack.c.bf16 %v3744_v63, %v3743_v62 }
 0x662   : > { %v3840_v11 = vpop.f32.mrb[12].mxu0 }
 0x663   : > { %v3841_v14 = vpop.f32.mrb[13].mxu0 }
 0x664   : > { %v6753_v16 = vadd.f32 %v3841_v14, %v3840_v11  ;;  %v4774_v11 = vpack.c.bf16 %v3752_v10, %v3751_v9  ;;  %v3753_v14 = vld [vmem:[%s7057_s9 + $0x1c0] sm:$0xff] }
 0x666   : > { %4066 = vmatmul.mubr.f32.vlgmr.msra.gmra.mrb[14].mxu0 %v6753_v16  ;;  %v2908_v49 = vrot.slane %v6753_v16, 1  ;;  %v2998_v0 = vrot.slane %v6753_v16, 2  ;;  %v3088_v34 = vrot.slane %v6753_v16, 3  ;;  %v3172_v16 = vld [vmem:[%s7059_s11 + $0x50] sm:$0xff] }
 0x667   : > { %4718 = vmatpush3.bf16.msra.mxu0 %v4717_v15  ;;  %4100 = vmatprep.mubr.msk.f32.mxu0 %vm5002_vm3, %v5003_v13  ;;  %v3754_v15 = vld [vmem:[%s7057_s9 + $0x1c8] sm:$0xff] }
 0x668   : > { %4719 = vmatprep.subr.bf16.mxu0 %v5000_v3  ;;  %v4777_v17 = vpack.c.bf16 %v3754_v15, %v3753_v14 }
 0x66b   : > { %4721 = vmatpush3.bf16.msra.mxu0 %v4720_v19  ;;  %v3756_v19 = vld [vmem:[%s7057_s9 + $0x1d8] sm:$0xff] }
 0x66c   : > { %4722 = vmatprep.subr.bf16.mxu0 %v5000_v3  ;;  %v4780_v20 = vpack.c.bf16 %v3756_v19, %v3755_v18 }
 0x66f   : > { %4724 = vmatpush3.bf16.msra.mxu0 %v4723_v22  ;;  %v3758_v22 = vld [vmem:[%s7057_s9 + $0x1e8] sm:$0xff] }
 0x670   : > { %4725 = vmatprep.subr.bf16.mxu0 %v5000_v3  ;;  %v4783_v23 = vpack.c.bf16 %v3758_v22, %v3757_v21 }
 0x673   : > { %4727 = vmatpush3.bf16.msra.mxu0 %v4726_v25  ;;  %v3760_v25 = vld [vmem:[%s7057_s9 + $0x1f8] sm:$0xff] }
 0x674   : > { %4728 = vmatprep.subr.bf16.mxu0 %v5000_v3  ;;  %v4786_v26 = vpack.c.bf16 %v3760_v25, %v3759_v24 }
 0x677   : > { %4730 = vmatpush3.bf16.msra.mxu0 %v4729_v43  ;;  %v3170_v43 = vld [vmem:[%s7059_s11 + $0x40] sm:$0xff] }
 0x678   : > { %4731 = vmatprep.subr.bf16.mxu0 %v5000_v3  ;;  %v4801_v28 = vpack.c.bf16 %v3171_v27, %v3170_v43 }
 0x67a   : > { %4802 = vmatpush3.bf16.msra.mxu1 %v4801_v28 }
 0x67b   : > { %4733 = vmatpush3.bf16.msra.mxu0 %v4732_v29  ;;  %4803 = vmatprep.subr.bf16.mxu1 %v5000_v3  ;;  %v3173_v29 = vld [vmem:[%s7059_s11 + $0x58] sm:$0xff] }
 0x67c   : > { %4734 = vmatprep.subr.bf16.mxu0 %v5000_v3  ;;  %v4804_v33 = vpack.c.bf16 %v3173_v29, %v3172_v16 }
 0x67e   : > { %4805 = vmatpush3.bf16.msra.mxu1 %v4804_v33 }
 0x67f   : > { %4736 = vmatpush3.bf16.msra.mxu0 %v4735_v37  ;;  %v3175_v37 = vld [vmem:[%s7059_s11 + $0x68] sm:$0xff]  ;;  %4806 = vmatprep.subr.bf16.mxu1 %v5000_v3 }
 0x680   : > { %4737 = vmatprep.subr.bf16.mxu0 %v5000_v3  ;;  %v4807_v39 = vpack.c.bf16 %v3175_v37, %v3174_v36 }
 0x682   : > { %4808 = vmatpush3.bf16.msra.mxu1 %v4807_v39 }
 0x683   : > { %4739 = vmatpush3.bf16.msra.mxu0 %v4738_v41  ;;  %4201 = vmatprep.subr.mxu1 %v5003_v13  ;;  %v3253_v41 = vld [vmem:[%s7061_s13] sm:$0xff] }
 0x684   : > { %4740 = vmatprep.subr.bf16.mxu0 %v5000_v3 }
 0x686   : > { %4101 = vmatmul.mubr.f32.vlgmr.msra.gmra.mrb[14].mxu0 %v2908_v49  ;;  %4202 = vmatpush3.msra.mxu1 %v3176_v40  ;;  %v3256_v49 = vld [vmem:[%s7061_s13 + $0x18] sm:$0xff] }
 0x687   : > { %4742 = vmatpush3.bf16.msra.mxu0 %v4741_v48  ;;  %4135 = vmatprep.mubr.msk.f32.mxu0 %vm5002_vm3, %v5003_v13  ;;  %v4810_v48 = vpack.c.bf16 %v3254_v44, %v3253_v41  ;;  %v4813_v50 = vpack.c.bf16 %v3256_v49, %v3255_v45 }
 0x688   : > { %4743 = vmatprep.subr.bf16.mxu0 %v5000_v3 }
 0x68b   : > { %4745 = vmatpush3.bf16.msra.mxu0 %v4744_v46 }
 0x68c   : > { %4746 = vmatprep.subr.bf16.mxu0 %v5000_v3 }
 0x68f   : > { %4748 = vmatpush3.bf16.msra.mxu0 %v4747_v52 }
 0x690   : > { %4749 = vmatprep.subr.bf16.mxu0 %v5000_v3 }
 0x693   : > { %4751 = vmatpush3.bf16.msra.mxu0 %v4750_v6  ;;  %v4816_v6 = vpack.c.bf16 %v3258_v38, %v3257_v4 }
 0x694   : > { %4752 = vmatprep.subr.bf16.mxu0 %v5000_v3 }
 0x697   : > { %4754 = vmatpush3.bf16.msra.mxu0 %v4753_v55  ;;  %v4819_v55 = vpack.c.bf16 %v3260_v54, %v3259_v53 }
 0x698   : > { %4755 = vmatprep.subr.bf16.mxu0 %v5000_v3 }
 0x69b   : > { %4757 = vmatpush3.bf16.msra.mxu0 %v4756_v58  ;;  %v4822_v58 = vpack.c.bf16 %v3262_v57, %v3261_v56 }
 0x69c   : > { %4758 = vmatprep.subr.bf16.mxu0 %v5000_v3 }
 0x69f   : > { %4760 = vmatpush3.bf16.msra.mxu0 %v4759_v61 }
 0x6a0   : > { %4761 = vmatprep.subr.bf16.mxu0 %v5000_v3 }
 0x6a3   : > { %4763 = vmatpush3.bf16.msra.mxu0 %v4762_v30 }
 0x6a4   : > { %4764 = vmatprep.subr.bf16.mxu0 %v5000_v3 }
 0x6a6   : > { %4136 = vmatmul.mubr.f32.vlgmr.msra.gmra.mrb[14].mxu0 %v2998_v0 }
 0x6a7   : > { %4766 = vmatpush3.bf16.msra.mxu0 %v4765_v32  ;;  %4170 = vmatprep.mubr.msk.f32.mxu0 %vm5002_vm3, %v5003_v13 }
 0x6a8   : > { %4767 = vmatprep.subr.bf16.mxu0 %v5000_v3 }
 0x6ab   : > { %4769 = vmatpush3.bf16.msra.mxu0 %v4768_v7 }
 0x6ac   : > { %4770 = vmatprep.subr.bf16.mxu0 %v5000_v3 }
 0x6af   : > { %4772 = vmatpush3.bf16.msra.mxu0 %v4771_v42 }
 0x6b0   : > { %4773 = vmatprep.subr.bf16.mxu0 %v5000_v3 }
 0x6b3   : > { %4775 = vmatpush3.bf16.msra.mxu0 %v4774_v11 }
 0x6b4   : > { %4776 = vmatprep.subr.bf16.mxu0 %v5000_v3 }
 0x6b7   : > { %4778 = vmatpush3.bf16.msra.mxu0 %v4777_v17 }
 0x6b8   : > { %4779 = vmatprep.subr.bf16.mxu0 %v5000_v3 }
 0x6bb   : > { %4781 = vmatpush3.bf16.msra.mxu0 %v4780_v20 }
 0x6bc   : > { %4782 = vmatprep.subr.bf16.mxu0 %v5000_v3 }
 0x6bf   : > { %4784 = vmatpush3.bf16.msra.mxu0 %v4783_v23 }
 0x6c0   : > { %4785 = vmatprep.subr.bf16.mxu0 %v5000_v3 }
 0x6c3   : > { %4787 = vmatpush3.bf16.msra.mxu0 %v4786_v26 }
 0x6c4   : > { %4809 = vmatprep.subr.bf16.mxu0 %v5000_v3 }
 0x6c6   : > { %4171 = vmatmul.mubr.f32.vlgmr.msra.gmra.mrb[14].mxu0 %v3088_v34 }
 0x6c7   : > { %4228 = vmatprep.mubr.msk.f32.mxu0 %vm5002_vm3, %v5003_v13  ;;  %4811 = vmatpush3.bf16.msra.mxu0 %v4810_v48 }
 0x6c8   : > { %4812 = vmatprep.subr.bf16.mxu0 %v5000_v3 }
 0x6cb   : > { %4814 = vmatpush3.bf16.msra.mxu0 %v4813_v50 }
 0x6cc   : > { %4815 = vmatprep.subr.bf16.mxu0 %v5000_v3 }
 0x6cf   : > { %4817 = vmatpush3.bf16.msra.mxu0 %v4816_v6 }
 0x6d0   : > { %4818 = vmatprep.subr.bf16.mxu0 %v5000_v3 }
 0x6d3   : > { %4820 = vmatpush3.bf16.msra.mxu0 %v4819_v55 }
 0x6d4   : > { %4821 = vmatprep.subr.bf16.mxu0 %v5000_v3  ;;  %v3264_v3 = vld [vmem:[%s7083_s20] sm:$0x1] }
 0x6d7   : > { %4823 = vmatpush3.bf16.msra.mxu0 %v4822_v58 }
 0x6d8   : > { %4226 = vmatprep.subr.mxu0 %v5003_v13 }
 0x6db   : > { %4227 = vmatpush3.msk.msra.mxu0 %vm540_vm0, %v3263_v59 }
 0x799   : > { %v3156_v46 = vpop.f32.mrb[14].mxu0 }
 0x79a   : > { %v4824_v51 = vadd.f32 %v3156_v46, %v2802_v35  ;;  %v4172_v47 = vpop.f32.mrb[15].mxu0 }
 0x79c   : > { %4932 = vtanh.f32 %v4824_v51 }
 0x7a6   : > { %v4933_v52 = vpop.eup %4932 }
 0x7a7   : > { %4204 = vmatmul.mubr.msk.f32.vlgmr.msra.gmra.mrb[38].mxu1 %vm3178_vm11, %v4933_v52 }
 0x87a   : > { %v3248_v61 = vpop.f32.mrb[38].mxu1 }
 0x87b   : > { %v3249_v62 = vadd.f32 %v3248_v61, %v3177_v60  ;;  %v4205_v63 = vpop.f32.mrb[39].mxu1 }
 0x87d   : > { %4934 = vtanh.f32 %v3249_v62 }
 0x887   : > { %v4935_v30 = vpop.eup %4934 }
 0x888   : > { %4229 = vmatmul.mubr.msk.f32.vlgmr.msra.gmra.mrb[16].mxu0 %vm3265_vm12, %v4935_v30 }
 0x95b   : > { %v3338_v13 = vpop.f32.mrb[16].mxu0 }
 0x95c   : > { %v3339_v12 = vadd.f32 %v3338_v13, %v3264_v3  ;;  %v4230_v31 = vpop.f32.mrb[17].mxu0 }
 0x95e   : > { %3343 = vst.msk [vmem:[%s486_s24] sm:$0x1] %vm3342_vm13, %v3339_v12 }
 0x95f   : > { %4949 = shalt.err (!%p4946_p3)
}
 0x960   : > { %s4950_s21 = scalar_lea.hbm %s7006_s17, 16  ;;  %s4954_s29 = scalar_lea.hbm %s7084_s25, 32 }
 0x961   : > { %p4951_p4 = scmp.ne.s32.totalorder %s7006_s17, %s4950_s21  ;;  %p4955_p9 = scmp.lt.u32.totalorder %s7006_s17, %s7084_s25 }
 0x962   : > { %p4956_p10 = scmp.lt.u32.totalorder %s4954_s29, %s4950_s21  ;;  %p4958_p12 = scmp.lt.u32.totalorder %s4950_s21, %s7006_s17 }
 0x963   : > { %p4952_p7 = pnand %p4951_p4, %p5123_p5 }
 0x964   : > { %p4957_p11 = por %p4956_p10, %p4955_p9 }
 0x965   : > { %p4953_p8 = pneg %p4952_p7 }
 0x966   : > { %p4959_p13 = por %p4958_p12, %p4957_p11 }
 0x968   : > { %p4960_p0 = pnand %p4959_p13, %p4953_p8 }
 0x96a   : > { %4963 = shalt.err (!%p4960_p0)
}
 0x96b   : > { %4867 = dma.vmem_to_hbm [thread:$0]  (%p5123_p5), %s7008_s18, 16, %s7006_s17, %s3345_s23  }
 0x96c PF: > { %s7085_s30 = sld [smem:[#allocation7_spill]]  ;;  %s7086_s14 = sld [smem:[#allocation5_spill]] }
 0x972   : > { %p4873_p1 = scmp.ge.s32.totalorder %s7085_s30, 2  ;;  %s3369_s15 = sand.u32 1, %s7086_s14  }
 0x973   : > { %s3370_s16 = scalar_lea.sflag [#allocation3], %s3369_s15 }
 0x974   : > { %p4870_p2 = pnand %p4873_p1, %p5127_p6 }
 0x976   : > { %4981 = dma.done.wait (!%p4870_p2), %s3370_s16, 16  }
 0x977   : > { %4983 = vsyncadd (!%p4870_p2), %s3370_s16, 4294967280  ;;  %s7088_s21 = sld [smem:[#allocation8_spill]]  ;;  %s7089_s26 = sld [smem:[#allocation6_spill]] }
 0x978   : > { %s7090_s20 = sld [smem:[#allocation9_spill]]  ;;  %s7091_s18 = smov %s4990_s19 }
 0x97d   : > { %p25_p3 = scmp.ge.s32.totalorder %s7088_s21, 4   ;;  %s7092_s19 = smov %s7089_s26 }
 0x97f   :  { %27 = sbr.rel (!%p25_p3) target bundleno = 6 (0x6), region = 126 }
 0x986   :  { %3374 = vsyncpa [#allocation3], 1 }
 0x987   :  { %3376 = vsyncpa [#allocation3 + $0x1], 1 }

</bundles_post_ra>
